<compile_context>
chip_gen: v7x
topology: tpu7x:2x2x1
jax: 0.10.0
libtpu: 0.0.40
codegen_flags: <defaults>
</compile_context>

<pallas_src>
import jax
import jax.numpy as jnp
import numpy as np
from jax.experimental import pallas as pl
from jax.experimental.pallas import tpu as pltpu


# ----------------------------------------------------------------------------
# Fused Pallas kernel: whole 3-layer GAT stack over the (small) graph.
# ----------------------------------------------------------------------------
def gat_stack_kernel(h_ref, adj_ref,
                     w1_ref, al1_ref, ar1_ref, b1_ref,
                     w2_ref, al2_ref, ar2_ref, b2_ref,
                     w3_ref, al3_ref, ar3_ref, b3_ref,
                     out_ref, h1_scratch, h2_scratch):
    """
    h_ref       : (N, Din)     f32   node features
    adj_ref     : (N, N)       f32   adj[dst, src] = multiplicity of edge src->dst
    w*_ref      : (Din_l, H*D) f32   fc weight of layer l
    al*/ar*_ref : (H*D, H)     f32   block-diagonal attn_l / attn_r
    b*_ref      : (H, D)       f32   per-head bias
    out_ref     : (N, C)       f32   final graph features (head-averaged layer 3)
    h*_scratch  : (N, H*D)     f32   VMEM-resident inter-layer activations
    """
    adj = adj_ref[...]
    # Hoisted once for all layers / heads: additive -inf mask for non-edges.
    mask_neg = jnp.where(adj > 0.0, 0.0, -1e30).astype(jnp.float32)

    def gat_layer(h, w_ref, al_ref, ar_ref, b_ref, dst_ref, average):
        H, D = b_ref.shape
        # fc for all heads at once (f32 operands, f32 accumulation on the MXU).
        feat = jnp.dot(h, w_ref[...], preferred_element_type=jnp.float32)      # (N, H*D)
        # All-head attention scores via two small MXU matmuls (no per-head slices).
        el = jnp.dot(feat, al_ref[...], preferred_element_type=jnp.float32)    # (N, H) src scores
        er = jnp.dot(feat, ar_ref[...], preferred_element_type=jnp.float32)    # (N, H) dst scores
        el_t = el.T                                                             # (H, N), one transpose/layer
        acc = None
        for hh in range(H):                                                     # static unroll over heads
            e = er[:, hh:hh + 1] + el_t[hh:hh + 1, :]                           # (N_dst, N_src)
            e = jnp.where(e >= 0.0, e, 0.2 * e)                                 # LeakyReLU(0.2)
            e = e + mask_neg                                                    # mask non-edges
            e_max = jnp.max(e, axis=-1, keepdims=True)
            p = jnp.exp(e - e_max) * adj                                        # multi-edge multiplicity
            att = p / jnp.maximum(jnp.sum(p, axis=-1, keepdims=True), 1e-20)    # edge softmax per dst
            o = jnp.dot(att, feat[:, hh * D:(hh + 1) * D],
                        preferred_element_type=jnp.float32) + b_ref[hh:hh + 1, :]
            if average:                                   # DGL Avg(): mean over heads
                acc = o if acc is None else acc + o
            else:                                         # DGL Concat(): lane-dense (N, H*D)
                dst_ref[:, hh * D:(hh + 1) * D] = o
        if average:
            dst_ref[...] = acc / H

    gat_layer(h_ref[...], w1_ref, al1_ref, ar1_ref, b1_ref, h1_scratch, average=False)
    gat_layer(h1_scratch[...], w2_ref, al2_ref, ar2_ref, b2_ref, h2_scratch, average=False)
    gat_layer(h2_scratch[...], w3_ref, al3_ref, ar3_ref, b3_ref, out_ref, average=True)


# ----------------------------------------------------------------------------
# Host-side weight preparation (layout plumbing, done once per forward).
# ----------------------------------------------------------------------------
def _block_diag_cols(a):
    """(H, D) -> (H*D, H): column h holds a[h] on rows h*D:(h+1)*D (zeros elsewhere)."""
    H, D = a.shape
    eye = jnp.eye(H, dtype=a.dtype)
    return (a[:, :, None] * eye[:, None, :]).reshape(H * D, H)


def prep_gat_params(params):
    """f32 fc weights, block-diagonal f32 attn_l/attn_r, f32 per-head bias."""
    def layer(w, al, ar, b):
        return (w.astype(jnp.float32),
                _block_diag_cols(al).astype(jnp.float32),
                _block_diag_cols(ar).astype(jnp.float32),
                b.astype(jnp.float32))
    return (layer(params["w1"], params["al1"], params["ar1"], params["b1"]),
            layer(params["w2"], params["al2"], params["ar2"], params["b2"]),
            layer(params["w3"], params["al3"], params["ar3"], params["b3"]))


def _gat_cost(N, Din, head_dims, in_arrays, out_bytes):
    flops, trans = 0, 0
    din = Din
    for (H, D) in head_dims:
        flops += 2 * N * din * H * D               # fc
        flops += 2 * (2 * N * H * D * H)           # attn_l / attn_r score matmuls
        flops += H * (8 * N * N + 2 * N * N * D)   # softmax elementwise + aggregation
        trans += H * N * N                         # exp
        din = H * D
    bytes_accessed = sum(int(np.prod(x.shape)) * x.dtype.itemsize for x in in_arrays)
    return int(flops), int(trans), int(bytes_accessed + out_bytes)


def gat_stack_pallas(h, adj, prepped):
    (w1, al1, ar1, b1), (w2, al2, ar2, b2), (w3, al3, ar3, b3) = prepped
    N, Din = h.shape
    (H1, D1), (H2, D2), (H3, D3) = b1.shape, b2.shape, b3.shape
    inputs = [h, adj, w1, al1, ar1, b1, w2, al2, ar2, b2, w3, al3, ar3, b3]

    def full(shape):
        nd = len(shape)
        return pl.BlockSpec(shape, lambda i, _n=nd: (0,) * _n)

    flops, trans, byts = _gat_cost(N, Din, [(H1, D1), (H2, D2), (H3, D3)],
                                   inputs, N * D3 * 4)

    # TODO(synk): for batched scene graphs add a leading "parallel" grid axis over
    # graphs (engages the 2nd TensorCore on v7x and amortizes launch/DMA overhead).
    return pl.pallas_call(
        gat_stack_kernel,
        out_shape=jax.ShapeDtypeStruct((N, D3), jnp.float32),
        grid=(1,),
        in_specs=[full(x.shape) for x in inputs],
        out_specs=full((N, D3)),
        scratch_shapes=[pltpu.VMEM((N, H1 * D1), jnp.float32),
                        pltpu.VMEM((N, H2 * D2), jnp.float32)],
        compiler_params=pltpu.CompilerParams(dimension_semantics=("arbitrary",)),
        cost_estimate=pl.CostEstimate(flops=flops, transcendentals=trans,
                                      bytes_accessed=byts),
    )(*inputs)


# ----------------------------------------------------------------------------
# Pure-JAX reference with identical math (for correctness check).
# ----------------------------------------------------------------------------
def gat_stack_ref(h, adj, prepped):
    mask_neg = jnp.where(adj > 0.0, 0.0, -1e30).astype(jnp.float32)

    def layer(h, w, al_bd, ar_bd, b, average):
        H, D = b.shape
        feat = jnp.dot(h, w, preferred_element_type=jnp.float32)
        el = jnp.dot(feat, al_bd, preferred_element_type=jnp.float32)
        er = jnp.dot(feat, ar_bd, preferred_element_type=jnp.float32)
        el_t = el.T
        outs, acc = [], None
        for hh in range(H):
            e = er[:, hh:hh + 1] + el_t[hh:hh + 1, :]
            e = jnp.where(e >= 0.0, e, 0.2 * e)
            e = e + mask_neg
            e_max = jnp.max(e, axis=-1, keepdims=True)
            p = jnp.exp(e - e_max) * adj
            att = p / jnp.maximum(jnp.sum(p, axis=-1, keepdims=True), 1e-20)
            o = jnp.dot(att, feat[:, hh * D:(hh + 1) * D],
                        preferred_element_type=jnp.float32) + b[hh:hh + 1, :]
            if average:
                acc = o if acc is None else acc + o
            else:
                outs.append(o)
        return acc / H if average else jnp.concatenate(outs, axis=-1)

    l1, l2, l3 = prepped
    hc = layer(h, *l1, average=False)
    hc = layer(hc, *l2, average=False)
    return layer(hc, *l3, average=True)


# ----------------------------------------------------------------------------
# GATModel.forward (is_baseline=True path) — glue in JAX, hot path in Pallas.
# ----------------------------------------------------------------------------
def gat_model_forward(params, objs, triples, obj_to_img=None, boxes_gt=None,
                      src_image=None, gat_stack_fn=gat_stack_pallas):
    num_objs = objs.shape[0]
    s, p, o = triples[:, 0], triples[:, 1], triples[:, 2]

    obj_vecs = params["obj_emb"][objs]          # nn.Embedding(objs)  (N, 50)
    _pred_vecs = params["pred_emb"][p]          # computed as in reference; GAT uses node feats only

    # Dense adjacency with edge multiplicities, adj[dst, src] (edges are s -> o).
    adj = jnp.zeros((num_objs, num_objs), jnp.float32).at[o, s].add(1.0)

    # TODO(synk): the layout side-branch (prepare_keep_idx dropout, mask_image_in_bbox,
    # boxes_to_layout, conv_img) is computed but never returned by the reference forward
    # and relies on externals not defined in the source; it is skipped here.

    graph_features = gat_stack_fn(obj_vecs, adj, prep_gat_params(params))
    return graph_features, num_objs


# ----------------------------------------------------------------------------
# Deterministic parameter init (synthetic stand-ins for GloVe + GATConv weights).
# ----------------------------------------------------------------------------
def init_params(key, num_obj_cats, num_pred_cats, embedding_dim):
    ks = jax.random.split(key, 14)

    def nrm(k, shape, scale=0.1):
        return (scale * jax.random.normal(k, shape)).astype(jnp.float32)

    p = {}
    p["obj_emb"] = nrm(ks[0], (num_obj_cats, embedding_dim), 1.0)   # GloVe stand-in
    p["pred_emb"] = nrm(ks[1], (num_pred_cats, embedding_dim), 1.0)
    # GATConv(embedding_dim, 64, 4)
    p["w1"] = nrm(ks[2], (embedding_dim, 4 * 64))
    p["al1"] = nrm(ks[3], (4, 64))
    p["ar1"] = nrm(ks[4], (4, 64))
    p["b1"] = nrm(ks[5], (4, 64))
    # GATConv(256, 64, 4)
    p["w2"] = nrm(ks[6], (256, 4 * 64))
    p["al2"] = nrm(ks[7], (4, 64))
    p["ar2"] = nrm(ks[8], (4, 64))
    p["b2"] = nrm(ks[9], (4, 64))
    # GATConv(256, num_obj_cats, 6)
    p["w3"] = nrm(ks[10], (256, 6 * num_obj_cats))
    p["al3"] = nrm(ks[11], (6, num_obj_cats))
    p["ar3"] = nrm(ks[12], (6, num_obj_cats))
    p["b3"] = nrm(ks[13], (6, num_obj_cats))
    return p


if __name__ == "__main__":
    key = jax.random.PRNGKey(0)
    kp, k_objs, k_s, k_o, k_p, k_box, k_img = jax.random.split(key, 7)

    NUM_OBJ_CATS, NUM_PRED_CATS, EMB = 32, 16, 50
    N, T = 8, 10   # num scene-graph objects / triples

    params = init_params(kp, NUM_OBJ_CATS, NUM_PRED_CATS, EMB)

    objs = jax.random.randint(k_objs, (N,), 0, NUM_OBJ_CATS)
    s_idx = jax.random.randint(k_s, (T,), 0, N)
    # ensure every node has at least one incoming edge (DGL GATConv zero-in-degree guard)
    o_idx = jnp.concatenate([jnp.arange(N, dtype=jnp.int32),
                             jax.random.randint(k_o, (T - N,), 0, N)])
    p_idx = jax.random.randint(k_p, (T,), 0, NUM_PRED_CATS)
    triples = jnp.stack([s_idx, p_idx, o_idx], axis=1)           # (T, 3) = [s, p, o]

    boxes_gt = jax.random.uniform(k_box, (N, 4), dtype=jnp.float32)
    obj_to_img = jnp.zeros((N,), jnp.int32)
    src_image = jax.random.normal(k_img, (1, 4, 16, 16), jnp.float32)   # NCHW

    graph_features, num_objs = gat_model_forward(
        params, objs, triples, obj_to_img=obj_to_img, boxes_gt=boxes_gt,
        src_image=src_image, gat_stack_fn=gat_stack_pallas)
    graph_features = jax.block_until_ready(graph_features)

    ref_features, _ = gat_model_forward(
        params, objs, triples, obj_to_img=obj_to_img, boxes_gt=boxes_gt,
        src_image=src_image, gat_stack_fn=gat_stack_ref)
    ref_features = jax.block_until_ready(ref_features)

    assert graph_features.shape == (N, NUM_OBJ_CATS)
    assert num_objs == N
    # Tolerance covers MXU default-precision matmuls in the XLA reference vs the
    # Pallas lowering; a real math bug would produce O(1) discrepancies.
    np.testing.assert_allclose(np.asarray(graph_features), np.asarray(ref_features),
                               rtol=2e-2, atol=2e-2)
    print("KERNEL_OK")
</pallas_src>

<mosaic_0001>
module attributes {stable_mosaic.version = 11 : i64} {
  func.func @gat_stack_kernel(%arg0: i32, %arg1: memref<8x50xf32, #tpu.memory_space<vmem>>, %arg2: memref<8x8xf32, #tpu.memory_space<vmem>>, %arg3: memref<50x256xf32, #tpu.memory_space<vmem>>, %arg4: memref<256x4xf32, #tpu.memory_space<vmem>>, %arg5: memref<256x4xf32, #tpu.memory_space<vmem>>, %arg6: memref<4x64xf32, #tpu.memory_space<vmem>>, %arg7: memref<256x256xf32, #tpu.memory_space<vmem>>, %arg8: memref<256x4xf32, #tpu.memory_space<vmem>>, %arg9: memref<256x4xf32, #tpu.memory_space<vmem>>, %arg10: memref<4x64xf32, #tpu.memory_space<vmem>>, %arg11: memref<256x192xf32, #tpu.memory_space<vmem>>, %arg12: memref<192x6xf32, #tpu.memory_space<vmem>>, %arg13: memref<192x6xf32, #tpu.memory_space<vmem>>, %arg14: memref<6x32xf32, #tpu.memory_space<vmem>>, %arg15: memref<8x32xf32, #tpu.memory_space<vmem>>, %arg16: memref<8x256xf32, #tpu.memory_space<vmem>>, %arg17: memref<8x256xf32, #tpu.memory_space<vmem>>) attributes {dimension_semantics = [#tpu.dimension_semantics<arbitrary>], iteration_bounds = array<i64: 1>, scalar_prefetch = 0 : i64, scratch_operands = 2 : i64, tpu.core_type = #tpu.core_type<tc>, window_params = [{pipeline_mode = #tpu.pipeline_mode<synchronous>, transform_indices = @transform_0, window_bounds = array<i64: 8, 50>}, {pipeline_mode = #tpu.pipeline_mode<synchronous>, transform_indices = @transform_1, window_bounds = array<i64: 8, 8>}, {pipeline_mode = #tpu.pipeline_mode<synchronous>, transform_indices = @transform_2, window_bounds = array<i64: 50, 256>}, {pipeline_mode = #tpu.pipeline_mode<synchronous>, transform_indices = @transform_3, window_bounds = array<i64: 256, 4>}, {pipeline_mode = #tpu.pipeline_mode<synchronous>, transform_indices = @transform_4, window_bounds = array<i64: 256, 4>}, {pipeline_mode = #tpu.pipeline_mode<synchronous>, transform_indices = @transform_5, window_bounds = array<i64: 4, 64>}, {pipeline_mode = #tpu.pipeline_mode<synchronous>, transform_indices = @transform_6, window_bounds = array<i64: 256, 256>}, {pipeline_mode = #tpu.pipeline_mode<synchronous>, transform_indices = @transform_7, window_bounds = array<i64: 256, 4>}, {pipeline_mode = #tpu.pipeline_mode<synchronous>, transform_indices = @transform_8, window_bounds = array<i64: 256, 4>}, {pipeline_mode = #tpu.pipeline_mode<synchronous>, transform_indices = @transform_9, window_bounds = array<i64: 4, 64>}, {pipeline_mode = #tpu.pipeline_mode<synchronous>, transform_indices = @transform_10, window_bounds = array<i64: 256, 192>}, {pipeline_mode = #tpu.pipeline_mode<synchronous>, transform_indices = @transform_11, window_bounds = array<i64: 192, 6>}, {pipeline_mode = #tpu.pipeline_mode<synchronous>, transform_indices = @transform_12, window_bounds = array<i64: 192, 6>}, {pipeline_mode = #tpu.pipeline_mode<synchronous>, transform_indices = @transform_13, window_bounds = array<i64: 6, 32>}, {pipeline_mode = #tpu.pipeline_mode<synchronous>, transform_indices = @transform_14, window_bounds = array<i64: 8, 32>}]} {
    %c0 = arith.constant 0 : index
    %c0_0 = arith.constant 0 : index
    %0 = vector.load %arg2[%c0, %c0_0] : memref<8x8xf32, #tpu.memory_space<vmem>>, vector<8x8xf32>
    %cst = arith.constant 0.000000e+00 : f32
    %1 = vector.broadcast %cst : f32 to vector<8x8xf32>
    %2 = arith.cmpf ogt, %0, %1 : vector<8x8xf32>
    %cst_1 = arith.constant 0.000000e+00 : f32
    %cst_2 = arith.constant -1.000000e+30 : f32
    %3 = vector.broadcast %cst_1 : f32 to vector<8x8xf32>
    %4 = vector.broadcast %cst_2 : f32 to vector<8x8xf32>
    %5 = arith.select %2, %3, %4 : vector<8x8xi1>, vector<8x8xf32>
    %c0_3 = arith.constant 0 : index
    %c0_4 = arith.constant 0 : index
    %6 = vector.load %arg1[%c0_3, %c0_4] : memref<8x50xf32, #tpu.memory_space<vmem>>, vector<8x50xf32>
    %c0_5 = arith.constant 0 : index
    %c0_6 = arith.constant 0 : index
    %7 = vector.load %arg3[%c0_5, %c0_6] : memref<50x256xf32, #tpu.memory_space<vmem>>, vector<50x256xf32>
    %cst_7 = arith.constant dense<0.000000e+00> : vector<8x256xf32>
    %8 = tpu.matmul %6, %7, %cst_7 {dimension_numbers = #tpu.dot_dimension_numbers<[1], [0], [0], [1], [0, 0, 1, 1], [], []>} : vector<8x50xf32>, vector<50x256xf32>, vector<8x256xf32> -> vector<8x256xf32>
    %c0_8 = arith.constant 0 : index
    %c0_9 = arith.constant 0 : index
    %9 = vector.load %arg4[%c0_8, %c0_9] : memref<256x4xf32, #tpu.memory_space<vmem>>, vector<256x4xf32>
    %cst_10 = arith.constant dense<0.000000e+00> : vector<8x4xf32>
    %10 = tpu.matmul %8, %9, %cst_10 {dimension_numbers = #tpu.dot_dimension_numbers<[1], [0], [0], [1], [0, 0, 1, 1], [], []>} : vector<8x256xf32>, vector<256x4xf32>, vector<8x4xf32> -> vector<8x4xf32>
    %c0_11 = arith.constant 0 : index
    %c0_12 = arith.constant 0 : index
    %11 = vector.load %arg5[%c0_11, %c0_12] : memref<256x4xf32, #tpu.memory_space<vmem>>, vector<256x4xf32>
    %cst_13 = arith.constant dense<0.000000e+00> : vector<8x4xf32>
    %12 = tpu.matmul %8, %11, %cst_13 {dimension_numbers = #tpu.dot_dimension_numbers<[1], [0], [0], [1], [0, 0, 1, 1], [], []>} : vector<8x256xf32>, vector<256x4xf32>, vector<8x4xf32> -> vector<8x4xf32>
    %13 = tpu.transpose %10, [1, 0] : vector<8x4xf32> -> vector<4x8xf32>
    %14 = vector.extract_strided_slice %12 {offsets = [0, 0], sizes = [8, 1], strides = [1, 1]} : vector<8x4xf32> to vector<8x1xf32>
    %15 = vector.extract_strided_slice %13 {offsets = [0, 0], sizes = [1, 8], strides = [1, 1]} : vector<4x8xf32> to vector<1x8xf32>
    %16 = vector.broadcast %14 : vector<8x1xf32> to vector<8x8xf32>
    %17 = vector.broadcast %15 : vector<1x8xf32> to vector<8x8xf32>
    %18 = arith.addf %16, %17 : vector<8x8xf32>
    %cst_14 = arith.constant 0.000000e+00 : f32
    %19 = vector.broadcast %cst_14 : f32 to vector<8x8xf32>
    %20 = arith.cmpf oge, %18, %19 : vector<8x8xf32>
    %cst_15 = arith.constant 2.000000e-01 : f32
    %21 = vector.broadcast %cst_15 : f32 to vector<8x8xf32>
    %22 = arith.mulf %21, %18 : vector<8x8xf32>
    %23 = arith.select %20, %18, %22 : vector<8x8xi1>, vector<8x8xf32>
    %24 = arith.addf %23, %5 : vector<8x8xf32>
    %cst_16 = arith.constant dense<0xFF800000> : vector<8xf32>
    %25 = vector.multi_reduction <maximumf>, %24, %cst_16 [1] : vector<8x8xf32> to vector<8xf32>
    %26 = vector.shape_cast %25 : vector<8xf32> to vector<8x1xf32>
    %27 = vector.broadcast %26 : vector<8x1xf32> to vector<8x8xf32>
    %28 = arith.subf %24, %27 : vector<8x8xf32>
    %29 = math.exp %28 : vector<8x8xf32>
    %30 = arith.mulf %29, %0 : vector<8x8xf32>
    %cst_17 = arith.constant dense<0.000000e+00> : vector<8xf32>
    %31 = vector.multi_reduction <add>, %30, %cst_17 [1] : vector<8x8xf32> to vector<8xf32>
    %32 = vector.shape_cast %31 : vector<8xf32> to vector<8x1xf32>
    %cst_18 = arith.constant 9.99999968E-21 : f32
    %33 = vector.broadcast %cst_18 : f32 to vector<8x1xf32>
    %34 = arith.maximumf %32, %33 : vector<8x1xf32>
    %35 = vector.broadcast %34 : vector<8x1xf32> to vector<8x8xf32>
    %36 = arith.divf %30, %35 : vector<8x8xf32>
    %37 = vector.extract_strided_slice %8 {offsets = [0, 0], sizes = [8, 64], strides = [1, 1]} : vector<8x256xf32> to vector<8x64xf32>
    %cst_19 = arith.constant dense<0.000000e+00> : vector<8x64xf32>
    %38 = tpu.matmul %36, %37, %cst_19 {dimension_numbers = #tpu.dot_dimension_numbers<[1], [0], [0], [1], [0, 0, 1, 1], [], []>} : vector<8x8xf32>, vector<8x64xf32>, vector<8x64xf32> -> vector<8x64xf32>
    %c0_20 = arith.constant 0 : index
    %c0_21 = arith.constant 0 : index
    %39 = vector.load %arg6[%c0_20, %c0_21] : memref<4x64xf32, #tpu.memory_space<vmem>>, vector<1x64xf32>
    %40 = vector.broadcast %39 : vector<1x64xf32> to vector<8x64xf32>
    %41 = arith.addf %38, %40 : vector<8x64xf32>
    %c0_22 = arith.constant 0 : index
    %c0_23 = arith.constant 0 : index
    %42 = vector.load %arg16[%c0_22, %c0_23] : memref<8x256xf32, #tpu.memory_space<vmem>>, vector<8x64xf32>
    tpu.vector_store %arg16[%c0_22, %c0_23], %41 {strides = array<i32>} : memref<8x256xf32, #tpu.memory_space<vmem>>, vector<8x64xf32>,
    %43 = vector.extract_strided_slice %12 {offsets = [0, 1], sizes = [8, 1], strides = [1, 1]} : vector<8x4xf32> to vector<8x1xf32>
    %44 = vector.extract_strided_slice %13 {offsets = [1, 0], sizes = [1, 8], strides = [1, 1]} : vector<4x8xf32> to vector<1x8xf32>
    %45 = vector.broadcast %43 : vector<8x1xf32> to vector<8x8xf32>
    %46 = vector.broadcast %44 : vector<1x8xf32> to vector<8x8xf32>
    %47 = arith.addf %45, %46 : vector<8x8xf32>
    %cst_24 = arith.constant 0.000000e+00 : f32
    %48 = vector.broadcast %cst_24 : f32 to vector<8x8xf32>
    %49 = arith.cmpf oge, %47, %48 : vector<8x8xf32>
    %cst_25 = arith.constant 2.000000e-01 : f32
    %50 = vector.broadcast %cst_25 : f32 to vector<8x8xf32>
    %51 = arith.mulf %50, %47 : vector<8x8xf32>
    %52 = arith.select %49, %47, %51 : vector<8x8xi1>, vector<8x8xf32>
    %53 = arith.addf %52, %5 : vector<8x8xf32>
    %cst_26 = arith.constant dense<0xFF800000> : vector<8xf32>
    %54 = vector.multi_reduction <maximumf>, %53, %cst_26 [1] : vector<8x8xf32> to vector<8xf32>
    %55 = vector.shape_cast %54 : vector<8xf32> to vector<8x1xf32>
    %56 = vector.broadcast %55 : vector<8x1xf32> to vector<8x8xf32>
    %57 = arith.subf %53, %56 : vector<8x8xf32>
    %58 = math.exp %57 : vector<8x8xf32>
    %59 = arith.mulf %58, %0 : vector<8x8xf32>
    %cst_27 = arith.constant dense<0.000000e+00> : vector<8xf32>
    %60 = vector.multi_reduction <add>, %59, %cst_27 [1] : vector<8x8xf32> to vector<8xf32>
    %61 = vector.shape_cast %60 : vector<8xf32> to vector<8x1xf32>
    %cst_28 = arith.constant 9.99999968E-21 : f32
    %62 = vector.broadcast %cst_28 : f32 to vector<8x1xf32>
    %63 = arith.maximumf %61, %62 : vector<8x1xf32>
    %64 = vector.broadcast %63 : vector<8x1xf32> to vector<8x8xf32>
    %65 = arith.divf %59, %64 : vector<8x8xf32>
    %66 = vector.extract_strided_slice %8 {offsets = [0, 64], sizes = [8, 64], strides = [1, 1]} : vector<8x256xf32> to vector<8x64xf32>
    %cst_29 = arith.constant dense<0.000000e+00> : vector<8x64xf32>
    %67 = tpu.matmul %65, %66, %cst_29 {dimension_numbers = #tpu.dot_dimension_numbers<[1], [0], [0], [1], [0, 0, 1, 1], [], []>} : vector<8x8xf32>, vector<8x64xf32>, vector<8x64xf32> -> vector<8x64xf32>
    %c1 = arith.constant 1 : index
    %c0_30 = arith.constant 0 : index
    %68 = vector.load %arg6[%c1, %c0_30] : memref<4x64xf32, #tpu.memory_space<vmem>>, vector<1x64xf32>
    %69 = vector.broadcast %68 : vector<1x64xf32> to vector<8x64xf32>
    %70 = arith.addf %67, %69 : vector<8x64xf32>
    %c0_31 = arith.constant 0 : index
    %c64 = arith.constant 64 : index
    %71 = vector.load %arg16[%c0_31, %c64] : memref<8x256xf32, #tpu.memory_space<vmem>>, vector<8x64xf32>
    tpu.vector_store %arg16[%c0_31, %c64], %70 {strides = array<i32>} : memref<8x256xf32, #tpu.memory_space<vmem>>, vector<8x64xf32>,
    %72 = vector.extract_strided_slice %12 {offsets = [0, 2], sizes = [8, 1], strides = [1, 1]} : vector<8x4xf32> to vector<8x1xf32>
    %73 = vector.extract_strided_slice %13 {offsets = [2, 0], sizes = [1, 8], strides = [1, 1]} : vector<4x8xf32> to vector<1x8xf32>
    %74 = vector.broadcast %72 : vector<8x1xf32> to vector<8x8xf32>
    %75 = vector.broadcast %73 : vector<1x8xf32> to vector<8x8xf32>
    %76 = arith.addf %74, %75 : vector<8x8xf32>
    %cst_32 = arith.constant 0.000000e+00 : f32
    %77 = vector.broadcast %cst_32 : f32 to vector<8x8xf32>
    %78 = arith.cmpf oge, %76, %77 : vector<8x8xf32>
    %cst_33 = arith.constant 2.000000e-01 : f32
    %79 = vector.broadcast %cst_33 : f32 to vector<8x8xf32>
    %80 = arith.mulf %79, %76 : vector<8x8xf32>
    %81 = arith.select %78, %76, %80 : vector<8x8xi1>, vector<8x8xf32>
    %82 = arith.addf %81, %5 : vector<8x8xf32>
    %cst_34 = arith.constant dense<0xFF800000> : vector<8xf32>
    %83 = vector.multi_reduction <maximumf>, %82, %cst_34 [1] : vector<8x8xf32> to vector<8xf32>
    %84 = vector.shape_cast %83 : vector<8xf32> to vector<8x1xf32>
    %85 = vector.broadcast %84 : vector<8x1xf32> to vector<8x8xf32>
    %86 = arith.subf %82, %85 : vector<8x8xf32>
    %87 = math.exp %86 : vector<8x8xf32>
    %88 = arith.mulf %87, %0 : vector<8x8xf32>
    %cst_35 = arith.constant dense<0.000000e+00> : vector<8xf32>
    %89 = vector.multi_reduction <add>, %88, %cst_35 [1] : vector<8x8xf32> to vector<8xf32>
    %90 = vector.shape_cast %89 : vector<8xf32> to vector<8x1xf32>
    %cst_36 = arith.constant 9.99999968E-21 : f32
    %91 = vector.broadcast %cst_36 : f32 to vector<8x1xf32>
    %92 = arith.maximumf %90, %91 : vector<8x1xf32>
    %93 = vector.broadcast %92 : vector<8x1xf32> to vector<8x8xf32>
    %94 = arith.divf %88, %93 : vector<8x8xf32>
    %95 = vector.extract_strided_slice %8 {offsets = [0, 128], sizes = [8, 64], strides = [1, 1]} : vector<8x256xf32> to vector<8x64xf32>
    %cst_37 = arith.constant dense<0.000000e+00> : vector<8x64xf32>
    %96 = tpu.matmul %94, %95, %cst_37 {dimension_numbers = #tpu.dot_dimension_numbers<[1], [0], [0], [1], [0, 0, 1, 1], [], []>} : vector<8x8xf32>, vector<8x64xf32>, vector<8x64xf32> -> vector<8x64xf32>
    %c2 = arith.constant 2 : index
    %c0_38 = arith.constant 0 : index
    %97 = vector.load %arg6[%c2, %c0_38] : memref<4x64xf32, #tpu.memory_space<vmem>>, vector<1x64xf32>
    %98 = vector.broadcast %97 : vector<1x64xf32> to vector<8x64xf32>
    %99 = arith.addf %96, %98 : vector<8x64xf32>
    %c0_39 = arith.constant 0 : index
    %c128 = arith.constant 128 : index
    %100 = vector.load %arg16[%c0_39, %c128] : memref<8x256xf32, #tpu.memory_space<vmem>>, vector<8x64xf32>
    tpu.vector_store %arg16[%c0_39, %c128], %99 {strides = array<i32>} : memref<8x256xf32, #tpu.memory_space<vmem>>, vector<8x64xf32>,
    %101 = vector.extract_strided_slice %12 {offsets = [0, 3], sizes = [8, 1], strides = [1, 1]} : vector<8x4xf32> to vector<8x1xf32>
    %102 = vector.extract_strided_slice %13 {offsets = [3, 0], sizes = [1, 8], strides = [1, 1]} : vector<4x8xf32> to vector<1x8xf32>
    %103 = vector.broadcast %101 : vector<8x1xf32> to vector<8x8xf32>
    %104 = vector.broadcast %102 : vector<1x8xf32> to vector<8x8xf32>
    %105 = arith.addf %103, %104 : vector<8x8xf32>
    %cst_40 = arith.constant 0.000000e+00 : f32
    %106 = vector.broadcast %cst_40 : f32 to vector<8x8xf32>
    %107 = arith.cmpf oge, %105, %106 : vector<8x8xf32>
    %cst_41 = arith.constant 2.000000e-01 : f32
    %108 = vector.broadcast %cst_41 : f32 to vector<8x8xf32>
    %109 = arith.mulf %108, %105 : vector<8x8xf32>
    %110 = arith.select %107, %105, %109 : vector<8x8xi1>, vector<8x8xf32>
    %111 = arith.addf %110, %5 : vector<8x8xf32>
    %cst_42 = arith.constant dense<0xFF800000> : vector<8xf32>
    %112 = vector.multi_reduction <maximumf>, %111, %cst_42 [1] : vector<8x8xf32> to vector<8xf32>
    %113 = vector.shape_cast %112 : vector<8xf32> to vector<8x1xf32>
    %114 = vector.broadcast %113 : vector<8x1xf32> to vector<8x8xf32>
    %115 = arith.subf %111, %114 : vector<8x8xf32>
    %116 = math.exp %115 : vector<8x8xf32>
    %117 = arith.mulf %116, %0 : vector<8x8xf32>
    %cst_43 = arith.constant dense<0.000000e+00> : vector<8xf32>
    %118 = vector.multi_reduction <add>, %117, %cst_43 [1] : vector<8x8xf32> to vector<8xf32>
    %119 = vector.shape_cast %118 : vector<8xf32> to vector<8x1xf32>
    %cst_44 = arith.constant 9.99999968E-21 : f32
    %120 = vector.broadcast %cst_44 : f32 to vector<8x1xf32>
    %121 = arith.maximumf %119, %120 : vector<8x1xf32>
    %122 = vector.broadcast %121 : vector<8x1xf32> to vector<8x8xf32>
    %123 = arith.divf %117, %122 : vector<8x8xf32>
    %124 = vector.extract_strided_slice %8 {offsets = [0, 192], sizes = [8, 64], strides = [1, 1]} : vector<8x256xf32> to vector<8x64xf32>
    %cst_45 = arith.constant dense<0.000000e+00> : vector<8x64xf32>
    %125 = tpu.matmul %123, %124, %cst_45 {dimension_numbers = #tpu.dot_dimension_numbers<[1], [0], [0], [1], [0, 0, 1, 1], [], []>} : vector<8x8xf32>, vector<8x64xf32>, vector<8x64xf32> -> vector<8x64xf32>
    %c3 = arith.constant 3 : index
    %c0_46 = arith.constant 0 : index
    %126 = vector.load %arg6[%c3, %c0_46] : memref<4x64xf32, #tpu.memory_space<vmem>>, vector<1x64xf32>
    %127 = vector.broadcast %126 : vector<1x64xf32> to vector<8x64xf32>
    %128 = arith.addf %125, %127 : vector<8x64xf32>
    %c0_47 = arith.constant 0 : index
    %c192 = arith.constant 192 : index
    %129 = vector.load %arg16[%c0_47, %c192] : memref<8x256xf32, #tpu.memory_space<vmem>>, vector<8x64xf32>
    tpu.vector_store %arg16[%c0_47, %c192], %128 {strides = array<i32>} : memref<8x256xf32, #tpu.memory_space<vmem>>, vector<8x64xf32>,
    %c0_48 = arith.constant 0 : index
    %c0_49 = arith.constant 0 : index
    %130 = vector.load %arg16[%c0_48, %c0_49] : memref<8x256xf32, #tpu.memory_space<vmem>>, vector<8x256xf32>
    %c0_50 = arith.constant 0 : index
    %c0_51 = arith.constant 0 : index
    %131 = vector.load %arg7[%c0_50, %c0_51] : memref<256x256xf32, #tpu.memory_space<vmem>>, vector<256x256xf32>
    %cst_52 = arith.constant dense<0.000000e+00> : vector<8x256xf32>
    %132 = tpu.matmul %130, %131, %cst_52 {dimension_numbers = #tpu.dot_dimension_numbers<[1], [0], [0], [1], [0, 0, 1, 1], [], []>} : vector<8x256xf32>, vector<256x256xf32>, vector<8x256xf32> -> vector<8x256xf32>
    %c0_53 = arith.constant 0 : index
    %c0_54 = arith.constant 0 : index
    %133 = vector.load %arg8[%c0_53, %c0_54] : memref<256x4xf32, #tpu.memory_space<vmem>>, vector<256x4xf32>
    %cst_55 = arith.constant dense<0.000000e+00> : vector<8x4xf32>
    %134 = tpu.matmul %132, %133, %cst_55 {dimension_numbers = #tpu.dot_dimension_numbers<[1], [0], [0], [1], [0, 0, 1, 1], [], []>} : vector<8x256xf32>, vector<256x4xf32>, vector<8x4xf32> -> vector<8x4xf32>
    %c0_56 = arith.constant 0 : index
    %c0_57 = arith.constant 0 : index
    %135 = vector.load %arg9[%c0_56, %c0_57] : memref<256x4xf32, #tpu.memory_space<vmem>>, vector<256x4xf32>
    %cst_58 = arith.constant dense<0.000000e+00> : vector<8x4xf32>
    %136 = tpu.matmul %132, %135, %cst_58 {dimension_numbers = #tpu.dot_dimension_numbers<[1], [0], [0], [1], [0, 0, 1, 1], [], []>} : vector<8x256xf32>, vector<256x4xf32>, vector<8x4xf32> -> vector<8x4xf32>
    %137 = tpu.transpose %134, [1, 0] : vector<8x4xf32> -> vector<4x8xf32>
    %138 = vector.extract_strided_slice %136 {offsets = [0, 0], sizes = [8, 1], strides = [1, 1]} : vector<8x4xf32> to vector<8x1xf32>
    %139 = vector.extract_strided_slice %137 {offsets = [0, 0], sizes = [1, 8], strides = [1, 1]} : vector<4x8xf32> to vector<1x8xf32>
    %140 = vector.broadcast %138 : vector<8x1xf32> to vector<8x8xf32>
    %141 = vector.broadcast %139 : vector<1x8xf32> to vector<8x8xf32>
    %142 = arith.addf %140, %141 : vector<8x8xf32>
    %cst_59 = arith.constant 0.000000e+00 : f32
    %143 = vector.broadcast %cst_59 : f32 to vector<8x8xf32>
    %144 = arith.cmpf oge, %142, %143 : vector<8x8xf32>
    %cst_60 = arith.constant 2.000000e-01 : f32
    %145 = vector.broadcast %cst_60 : f32 to vector<8x8xf32>
    %146 = arith.mulf %145, %142 : vector<8x8xf32>
    %147 = arith.select %144, %142, %146 : vector<8x8xi1>, vector<8x8xf32>
    %148 = arith.addf %147, %5 : vector<8x8xf32>
    %cst_61 = arith.constant dense<0xFF800000> : vector<8xf32>
    %149 = vector.multi_reduction <maximumf>, %148, %cst_61 [1] : vector<8x8xf32> to vector<8xf32>
    %150 = vector.shape_cast %149 : vector<8xf32> to vector<8x1xf32>
    %151 = vector.broadcast %150 : vector<8x1xf32> to vector<8x8xf32>
    %152 = arith.subf %148, %151 : vector<8x8xf32>
    %153 = math.exp %152 : vector<8x8xf32>
    %154 = arith.mulf %153, %0 : vector<8x8xf32>
    %cst_62 = arith.constant dense<0.000000e+00> : vector<8xf32>
    %155 = vector.multi_reduction <add>, %154, %cst_62 [1] : vector<8x8xf32> to vector<8xf32>
    %156 = vector.shape_cast %155 : vector<8xf32> to vector<8x1xf32>
    %cst_63 = arith.constant 9.99999968E-21 : f32
    %157 = vector.broadcast %cst_63 : f32 to vector<8x1xf32>
    %158 = arith.maximumf %156, %157 : vector<8x1xf32>
    %159 = vector.broadcast %158 : vector<8x1xf32> to vector<8x8xf32>
    %160 = arith.divf %154, %159 : vector<8x8xf32>
    %161 = vector.extract_strided_slice %132 {offsets = [0, 0], sizes = [8, 64], strides = [1, 1]} : vector<8x256xf32> to vector<8x64xf32>
    %cst_64 = arith.constant dense<0.000000e+00> : vector<8x64xf32>
    %162 = tpu.matmul %160, %161, %cst_64 {dimension_numbers = #tpu.dot_dimension_numbers<[1], [0], [0], [1], [0, 0, 1, 1], [], []>} : vector<8x8xf32>, vector<8x64xf32>, vector<8x64xf32> -> vector<8x64xf32>
    %c0_65 = arith.constant 0 : index
    %c0_66 = arith.constant 0 : index
    %163 = vector.load %arg10[%c0_65, %c0_66] : memref<4x64xf32, #tpu.memory_space<vmem>>, vector<1x64xf32>
    %164 = vector.broadcast %163 : vector<1x64xf32> to vector<8x64xf32>
    %165 = arith.addf %162, %164 : vector<8x64xf32>
    %c0_67 = arith.constant 0 : index
    %c0_68 = arith.constant 0 : index
    %166 = vector.load %arg17[%c0_67, %c0_68] : memref<8x256xf32, #tpu.memory_space<vmem>>, vector<8x64xf32>
    tpu.vector_store %arg17[%c0_67, %c0_68], %165 {strides = array<i32>} : memref<8x256xf32, #tpu.memory_space<vmem>>, vector<8x64xf32>,
    %167 = vector.extract_strided_slice %136 {offsets = [0, 1], sizes = [8, 1], strides = [1, 1]} : vector<8x4xf32> to vector<8x1xf32>
    %168 = vector.extract_strided_slice %137 {offsets = [1, 0], sizes = [1, 8], strides = [1, 1]} : vector<4x8xf32> to vector<1x8xf32>
    %169 = vector.broadcast %167 : vector<8x1xf32> to vector<8x8xf32>
    %170 = vector.broadcast %168 : vector<1x8xf32> to vector<8x8xf32>
    %171 = arith.addf %169, %170 : vector<8x8xf32>
    %cst_69 = arith.constant 0.000000e+00 : f32
    %172 = vector.broadcast %cst_69 : f32 to vector<8x8xf32>
    %173 = arith.cmpf oge, %171, %172 : vector<8x8xf32>
    %cst_70 = arith.constant 2.000000e-01 : f32
    %174 = vector.broadcast %cst_70 : f32 to vector<8x8xf32>
    %175 = arith.mulf %174, %171 : vector<8x8xf32>
    %176 = arith.select %173, %171, %175 : vector<8x8xi1>, vector<8x8xf32>
    %177 = arith.addf %176, %5 : vector<8x8xf32>
    %cst_71 = arith.constant dense<0xFF800000> : vector<8xf32>
    %178 = vector.multi_reduction <maximumf>, %177, %cst_71 [1] : vector<8x8xf32> to vector<8xf32>
    %179 = vector.shape_cast %178 : vector<8xf32> to vector<8x1xf32>
    %180 = vector.broadcast %179 : vector<8x1xf32> to vector<8x8xf32>
    %181 = arith.subf %177, %180 : vector<8x8xf32>
    %182 = math.exp %181 : vector<8x8xf32>
    %183 = arith.mulf %182, %0 : vector<8x8xf32>
    %cst_72 = arith.constant dense<0.000000e+00> : vector<8xf32>
    %184 = vector.multi_reduction <add>, %183, %cst_72 [1] : vector<8x8xf32> to vector<8xf32>
    %185 = vector.shape_cast %184 : vector<8xf32> to vector<8x1xf32>
    %cst_73 = arith.constant 9.99999968E-21 : f32
    %186 = vector.broadcast %cst_73 : f32 to vector<8x1xf32>
    %187 = arith.maximumf %185, %186 : vector<8x1xf32>
    %188 = vector.broadcast %187 : vector<8x1xf32> to vector<8x8xf32>
    %189 = arith.divf %183, %188 : vector<8x8xf32>
    %190 = vector.extract_strided_slice %132 {offsets = [0, 64], sizes = [8, 64], strides = [1, 1]} : vector<8x256xf32> to vector<8x64xf32>
    %cst_74 = arith.constant dense<0.000000e+00> : vector<8x64xf32>
    %191 = tpu.matmul %189, %190, %cst_74 {dimension_numbers = #tpu.dot_dimension_numbers<[1], [0], [0], [1], [0, 0, 1, 1], [], []>} : vector<8x8xf32>, vector<8x64xf32>, vector<8x64xf32> -> vector<8x64xf32>
    %c1_75 = arith.constant 1 : index
    %c0_76 = arith.constant 0 : index
    %192 = vector.load %arg10[%c1_75, %c0_76] : memref<4x64xf32, #tpu.memory_space<vmem>>, vector<1x64xf32>
    %193 = vector.broadcast %192 : vector<1x64xf32> to vector<8x64xf32>
    %194 = arith.addf %191, %193 : vector<8x64xf32>
    %c0_77 = arith.constant 0 : index
    %c64_78 = arith.constant 64 : index
    %195 = vector.load %arg17[%c0_77, %c64_78] : memref<8x256xf32, #tpu.memory_space<vmem>>, vector<8x64xf32>
    tpu.vector_store %arg17[%c0_77, %c64_78], %194 {strides = array<i32>} : memref<8x256xf32, #tpu.memory_space<vmem>>, vector<8x64xf32>,
    %196 = vector.extract_strided_slice %136 {offsets = [0, 2], sizes = [8, 1], strides = [1, 1]} : vector<8x4xf32> to vector<8x1xf32>
    %197 = vector.extract_strided_slice %137 {offsets = [2, 0], sizes = [1, 8], strides = [1, 1]} : vector<4x8xf32> to vector<1x8xf32>
    %198 = vector.broadcast %196 : vector<8x1xf32> to vector<8x8xf32>
    %199 = vector.broadcast %197 : vector<1x8xf32> to vector<8x8xf32>
    %200 = arith.addf %198, %199 : vector<8x8xf32>
    %cst_79 = arith.constant 0.000000e+00 : f32
    %201 = vector.broadcast %cst_79 : f32 to vector<8x8xf32>
    %202 = arith.cmpf oge, %200, %201 : vector<8x8xf32>
    %cst_80 = arith.constant 2.000000e-01 : f32
    %203 = vector.broadcast %cst_80 : f32 to vector<8x8xf32>
    %204 = arith.mulf %203, %200 : vector<8x8xf32>
    %205 = arith.select %202, %200, %204 : vector<8x8xi1>, vector<8x8xf32>
    %206 = arith.addf %205, %5 : vector<8x8xf32>
    %cst_81 = arith.constant dense<0xFF800000> : vector<8xf32>
    %207 = vector.multi_reduction <maximumf>, %206, %cst_81 [1] : vector<8x8xf32> to vector<8xf32>
    %208 = vector.shape_cast %207 : vector<8xf32> to vector<8x1xf32>
    %209 = vector.broadcast %208 : vector<8x1xf32> to vector<8x8xf32>
    %210 = arith.subf %206, %209 : vector<8x8xf32>
    %211 = math.exp %210 : vector<8x8xf32>
    %212 = arith.mulf %211, %0 : vector<8x8xf32>
    %cst_82 = arith.constant dense<0.000000e+00> : vector<8xf32>
    %213 = vector.multi_reduction <add>, %212, %cst_82 [1] : vector<8x8xf32> to vector<8xf32>
    %214 = vector.shape_cast %213 : vector<8xf32> to vector<8x1xf32>
    %cst_83 = arith.constant 9.99999968E-21 : f32
    %215 = vector.broadcast %cst_83 : f32 to vector<8x1xf32>
    %216 = arith.maximumf %214, %215 : vector<8x1xf32>
    %217 = vector.broadcast %216 : vector<8x1xf32> to vector<8x8xf32>
    %218 = arith.divf %212, %217 : vector<8x8xf32>
    %219 = vector.extract_strided_slice %132 {offsets = [0, 128], sizes = [8, 64], strides = [1, 1]} : vector<8x256xf32> to vector<8x64xf32>
    %cst_84 = arith.constant dense<0.000000e+00> : vector<8x64xf32>
    %220 = tpu.matmul %218, %219, %cst_84 {dimension_numbers = #tpu.dot_dimension_numbers<[1], [0], [0], [1], [0, 0, 1, 1], [], []>} : vector<8x8xf32>, vector<8x64xf32>, vector<8x64xf32> -> vector<8x64xf32>
    %c2_85 = arith.constant 2 : index
    %c0_86 = arith.constant 0 : index
    %221 = vector.load %arg10[%c2_85, %c0_86] : memref<4x64xf32, #tpu.memory_space<vmem>>, vector<1x64xf32>
    %222 = vector.broadcast %221 : vector<1x64xf32> to vector<8x64xf32>
    %223 = arith.addf %220, %222 : vector<8x64xf32>
    %c0_87 = arith.constant 0 : index
    %c128_88 = arith.constant 128 : index
    %224 = vector.load %arg17[%c0_87, %c128_88] : memref<8x256xf32, #tpu.memory_space<vmem>>, vector<8x64xf32>
    tpu.vector_store %arg17[%c0_87, %c128_88], %223 {strides = array<i32>} : memref<8x256xf32, #tpu.memory_space<vmem>>, vector<8x64xf32>,
    %225 = vector.extract_strided_slice %136 {offsets = [0, 3], sizes = [8, 1], strides = [1, 1]} : vector<8x4xf32> to vector<8x1xf32>
    %226 = vector.extract_strided_slice %137 {offsets = [3, 0], sizes = [1, 8], strides = [1, 1]} : vector<4x8xf32> to vector<1x8xf32>
    %227 = vector.broadcast %225 : vector<8x1xf32> to vector<8x8xf32>
    %228 = vector.broadcast %226 : vector<1x8xf32> to vector<8x8xf32>
    %229 = arith.addf %227, %228 : vector<8x8xf32>
    %cst_89 = arith.constant 0.000000e+00 : f32
    %230 = vector.broadcast %cst_89 : f32 to vector<8x8xf32>
    %231 = arith.cmpf oge, %229, %230 : vector<8x8xf32>
    %cst_90 = arith.constant 2.000000e-01 : f32
    %232 = vector.broadcast %cst_90 : f32 to vector<8x8xf32>
    %233 = arith.mulf %232, %229 : vector<8x8xf32>
    %234 = arith.select %231, %229, %233 : vector<8x8xi1>, vector<8x8xf32>
    %235 = arith.addf %234, %5 : vector<8x8xf32>
    %cst_91 = arith.constant dense<0xFF800000> : vector<8xf32>
    %236 = vector.multi_reduction <maximumf>, %235, %cst_91 [1] : vector<8x8xf32> to vector<8xf32>
    %237 = vector.shape_cast %236 : vector<8xf32> to vector<8x1xf32>
    %238 = vector.broadcast %237 : vector<8x1xf32> to vector<8x8xf32>
    %239 = arith.subf %235, %238 : vector<8x8xf32>
    %240 = math.exp %239 : vector<8x8xf32>
    %241 = arith.mulf %240, %0 : vector<8x8xf32>
    %cst_92 = arith.constant dense<0.000000e+00> : vector<8xf32>
    %242 = vector.multi_reduction <add>, %241, %cst_92 [1] : vector<8x8xf32> to vector<8xf32>
    %243 = vector.shape_cast %242 : vector<8xf32> to vector<8x1xf32>
    %cst_93 = arith.constant 9.99999968E-21 : f32
    %244 = vector.broadcast %cst_93 : f32 to vector<8x1xf32>
    %245 = arith.maximumf %243, %244 : vector<8x1xf32>
    %246 = vector.broadcast %245 : vector<8x1xf32> to vector<8x8xf32>
    %247 = arith.divf %241, %246 : vector<8x8xf32>
    %248 = vector.extract_strided_slice %132 {offsets = [0, 192], sizes = [8, 64], strides = [1, 1]} : vector<8x256xf32> to vector<8x64xf32>
    %cst_94 = arith.constant dense<0.000000e+00> : vector<8x64xf32>
    %249 = tpu.matmul %247, %248, %cst_94 {dimension_numbers = #tpu.dot_dimension_numbers<[1], [0], [0], [1], [0, 0, 1, 1], [], []>} : vector<8x8xf32>, vector<8x64xf32>, vector<8x64xf32> -> vector<8x64xf32>
    %c3_95 = arith.constant 3 : index
    %c0_96 = arith.constant 0 : index
    %250 = vector.load %arg10[%c3_95, %c0_96] : memref<4x64xf32, #tpu.memory_space<vmem>>, vector<1x64xf32>
    %251 = vector.broadcast %250 : vector<1x64xf32> to vector<8x64xf32>
    %252 = arith.addf %249, %251 : vector<8x64xf32>
    %c0_97 = arith.constant 0 : index
    %c192_98 = arith.constant 192 : index
    %253 = vector.load %arg17[%c0_97, %c192_98] : memref<8x256xf32, #tpu.memory_space<vmem>>, vector<8x64xf32>
    tpu.vector_store %arg17[%c0_97, %c192_98], %252 {strides = array<i32>} : memref<8x256xf32, #tpu.memory_space<vmem>>, vector<8x64xf32>,
    %c0_99 = arith.constant 0 : index
    %c0_100 = arith.constant 0 : index
    %254 = vector.load %arg17[%c0_99, %c0_100] : memref<8x256xf32, #tpu.memory_space<vmem>>, vector<8x256xf32>
    %c0_101 = arith.constant 0 : index
    %c0_102 = arith.constant 0 : index
    %255 = vector.load %arg11[%c0_101, %c0_102] : memref<256x192xf32, #tpu.memory_space<vmem>>, vector<256x192xf32>
    %cst_103 = arith.constant dense<0.000000e+00> : vector<8x192xf32>
    %256 = tpu.matmul %254, %255, %cst_103 {dimension_numbers = #tpu.dot_dimension_numbers<[1], [0], [0], [1], [0, 0, 1, 1], [], []>} : vector<8x256xf32>, vector<256x192xf32>, vector<8x192xf32> -> vector<8x192xf32>
    %c0_104 = arith.constant 0 : index
    %c0_105 = arith.constant 0 : index
    %257 = vector.load %arg12[%c0_104, %c0_105] : memref<192x6xf32, #tpu.memory_space<vmem>>, vector<192x6xf32>
    %cst_106 = arith.constant dense<0.000000e+00> : vector<8x6xf32>
    %258 = tpu.matmul %256, %257, %cst_106 {dimension_numbers = #tpu.dot_dimension_numbers<[1], [0], [0], [1], [0, 0, 1, 1], [], []>} : vector<8x192xf32>, vector<192x6xf32>, vector<8x6xf32> -> vector<8x6xf32>
    %c0_107 = arith.constant 0 : index
    %c0_108 = arith.constant 0 : index
    %259 = vector.load %arg13[%c0_107, %c0_108] : memref<192x6xf32, #tpu.memory_space<vmem>>, vector<192x6xf32>
    %cst_109 = arith.constant dense<0.000000e+00> : vector<8x6xf32>
    %260 = tpu.matmul %256, %259, %cst_109 {dimension_numbers = #tpu.dot_dimension_numbers<[1], [0], [0], [1], [0, 0, 1, 1], [], []>} : vector<8x192xf32>, vector<192x6xf32>, vector<8x6xf32> -> vector<8x6xf32>
    %261 = tpu.transpose %258, [1, 0] : vector<8x6xf32> -> vector<6x8xf32>
    %262 = vector.extract_strided_slice %260 {offsets = [0, 0], sizes = [8, 1], strides = [1, 1]} : vector<8x6xf32> to vector<8x1xf32>
    %263 = vector.extract_strided_slice %261 {offsets = [0, 0], sizes = [1, 8], strides = [1, 1]} : vector<6x8xf32> to vector<1x8xf32>
    %264 = vector.broadcast %262 : vector<8x1xf32> to vector<8x8xf32>
    %265 = vector.broadcast %263 : vector<1x8xf32> to vector<8x8xf32>
    %266 = arith.addf %264, %265 : vector<8x8xf32>
    %cst_110 = arith.constant 0.000000e+00 : f32
    %267 = vector.broadcast %cst_110 : f32 to vector<8x8xf32>
    %268 = arith.cmpf oge, %266, %267 : vector<8x8xf32>
    %cst_111 = arith.constant 2.000000e-01 : f32
    %269 = vector.broadcast %cst_111 : f32 to vector<8x8xf32>
    %270 = arith.mulf %269, %266 : vector<8x8xf32>
    %271 = arith.select %268, %266, %270 : vector<8x8xi1>, vector<8x8xf32>
    %272 = arith.addf %271, %5 : vector<8x8xf32>
    %cst_112 = arith.constant dense<0xFF800000> : vector<8xf32>
    %273 = vector.multi_reduction <maximumf>, %272, %cst_112 [1] : vector<8x8xf32> to vector<8xf32>
    %274 = vector.shape_cast %273 : vector<8xf32> to vector<8x1xf32>
    %275 = vector.broadcast %274 : vector<8x1xf32> to vector<8x8xf32>
    %276 = arith.subf %272, %275 : vector<8x8xf32>
    %277 = math.exp %276 : vector<8x8xf32>
    %278 = arith.mulf %277, %0 : vector<8x8xf32>
    %cst_113 = arith.constant dense<0.000000e+00> : vector<8xf32>
    %279 = vector.multi_reduction <add>, %278, %cst_113 [1] : vector<8x8xf32> to vector<8xf32>
    %280 = vector.shape_cast %279 : vector<8xf32> to vector<8x1xf32>
    %cst_114 = arith.constant 9.99999968E-21 : f32
    %281 = vector.broadcast %cst_114 : f32 to vector<8x1xf32>
    %282 = arith.maximumf %280, %281 : vector<8x1xf32>
    %283 = vector.broadcast %282 : vector<8x1xf32> to vector<8x8xf32>
    %284 = arith.divf %278, %283 : vector<8x8xf32>
    %285 = vector.extract_strided_slice %256 {offsets = [0, 0], sizes = [8, 32], strides = [1, 1]} : vector<8x192xf32> to vector<8x32xf32>
    %cst_115 = arith.constant dense<0.000000e+00> : vector<8x32xf32>
    %286 = tpu.matmul %284, %285, %cst_115 {dimension_numbers = #tpu.dot_dimension_numbers<[1], [0], [0], [1], [0, 0, 1, 1], [], []>} : vector<8x8xf32>, vector<8x32xf32>, vector<8x32xf32> -> vector<8x32xf32>
    %c0_116 = arith.constant 0 : index
    %c0_117 = arith.constant 0 : index
    %287 = vector.load %arg14[%c0_116, %c0_117] : memref<6x32xf32, #tpu.memory_space<vmem>>, vector<1x32xf32>
    %288 = vector.broadcast %287 : vector<1x32xf32> to vector<8x32xf32>
    %289 = arith.addf %286, %288 : vector<8x32xf32>
    %290 = vector.extract_strided_slice %260 {offsets = [0, 1], sizes = [8, 1], strides = [1, 1]} : vector<8x6xf32> to vector<8x1xf32>
    %291 = vector.extract_strided_slice %261 {offsets = [1, 0], sizes = [1, 8], strides = [1, 1]} : vector<6x8xf32> to vector<1x8xf32>
    %292 = vector.broadcast %290 : vector<8x1xf32> to vector<8x8xf32>
    %293 = vector.broadcast %291 : vector<1x8xf32> to vector<8x8xf32>
    %294 = arith.addf %292, %293 : vector<8x8xf32>
    %cst_118 = arith.constant 0.000000e+00 : f32
    %295 = vector.broadcast %cst_118 : f32 to vector<8x8xf32>
    %296 = arith.cmpf oge, %294, %295 : vector<8x8xf32>
    %cst_119 = arith.constant 2.000000e-01 : f32
    %297 = vector.broadcast %cst_119 : f32 to vector<8x8xf32>
    %298 = arith.mulf %297, %294 : vector<8x8xf32>
    %299 = arith.select %296, %294, %298 : vector<8x8xi1>, vector<8x8xf32>
    %300 = arith.addf %299, %5 : vector<8x8xf32>
    %cst_120 = arith.constant dense<0xFF800000> : vector<8xf32>
    %301 = vector.multi_reduction <maximumf>, %300, %cst_120 [1] : vector<8x8xf32> to vector<8xf32>
    %302 = vector.shape_cast %301 : vector<8xf32> to vector<8x1xf32>
    %303 = vector.broadcast %302 : vector<8x1xf32> to vector<8x8xf32>
    %304 = arith.subf %300, %303 : vector<8x8xf32>
    %305 = math.exp %304 : vector<8x8xf32>
    %306 = arith.mulf %305, %0 : vector<8x8xf32>
    %cst_121 = arith.constant dense<0.000000e+00> : vector<8xf32>
    %307 = vector.multi_reduction <add>, %306, %cst_121 [1] : vector<8x8xf32> to vector<8xf32>
    %308 = vector.shape_cast %307 : vector<8xf32> to vector<8x1xf32>
    %cst_122 = arith.constant 9.99999968E-21 : f32
    %309 = vector.broadcast %cst_122 : f32 to vector<8x1xf32>
    %310 = arith.maximumf %308, %309 : vector<8x1xf32>
    %311 = vector.broadcast %310 : vector<8x1xf32> to vector<8x8xf32>
    %312 = arith.divf %306, %311 : vector<8x8xf32>
    %313 = vector.extract_strided_slice %256 {offsets = [0, 32], sizes = [8, 32], strides = [1, 1]} : vector<8x192xf32> to vector<8x32xf32>
    %cst_123 = arith.constant dense<0.000000e+00> : vector<8x32xf32>
    %314 = tpu.matmul %312, %313, %cst_123 {dimension_numbers = #tpu.dot_dimension_numbers<[1], [0], [0], [1], [0, 0, 1, 1], [], []>} : vector<8x8xf32>, vector<8x32xf32>, vector<8x32xf32> -> vector<8x32xf32>
    %c1_124 = arith.constant 1 : index
    %c0_125 = arith.constant 0 : index
    %315 = vector.load %arg14[%c1_124, %c0_125] : memref<6x32xf32, #tpu.memory_space<vmem>>, vector<1x32xf32>
    %316 = vector.broadcast %315 : vector<1x32xf32> to vector<8x32xf32>
    %317 = arith.addf %314, %316 : vector<8x32xf32>
    %318 = arith.addf %289, %317 : vector<8x32xf32>
    %319 = vector.extract_strided_slice %260 {offsets = [0, 2], sizes = [8, 1], strides = [1, 1]} : vector<8x6xf32> to vector<8x1xf32>
    %320 = vector.extract_strided_slice %261 {offsets = [2, 0], sizes = [1, 8], strides = [1, 1]} : vector<6x8xf32> to vector<1x8xf32>
    %321 = vector.broadcast %319 : vector<8x1xf32> to vector<8x8xf32>
    %322 = vector.broadcast %320 : vector<1x8xf32> to vector<8x8xf32>
    %323 = arith.addf %321, %322 : vector<8x8xf32>
    %cst_126 = arith.constant 0.000000e+00 : f32
    %324 = vector.broadcast %cst_126 : f32 to vector<8x8xf32>
    %325 = arith.cmpf oge, %323, %324 : vector<8x8xf32>
    %cst_127 = arith.constant 2.000000e-01 : f32
    %326 = vector.broadcast %cst_127 : f32 to vector<8x8xf32>
    %327 = arith.mulf %326, %323 : vector<8x8xf32>
    %328 = arith.select %325, %323, %327 : vector<8x8xi1>, vector<8x8xf32>
    %329 = arith.addf %328, %5 : vector<8x8xf32>
    %cst_128 = arith.constant dense<0xFF800000> : vector<8xf32>
    %330 = vector.multi_reduction <maximumf>, %329, %cst_128 [1] : vector<8x8xf32> to vector<8xf32>
    %331 = vector.shape_cast %330 : vector<8xf32> to vector<8x1xf32>
    %332 = vector.broadcast %331 : vector<8x1xf32> to vector<8x8xf32>
    %333 = arith.subf %329, %332 : vector<8x8xf32>
    %334 = math.exp %333 : vector<8x8xf32>
    %335 = arith.mulf %334, %0 : vector<8x8xf32>
    %cst_129 = arith.constant dense<0.000000e+00> : vector<8xf32>
    %336 = vector.multi_reduction <add>, %335, %cst_129 [1] : vector<8x8xf32> to vector<8xf32>
    %337 = vector.shape_cast %336 : vector<8xf32> to vector<8x1xf32>
    %cst_130 = arith.constant 9.99999968E-21 : f32
    %338 = vector.broadcast %cst_130 : f32 to vector<8x1xf32>
    %339 = arith.maximumf %337, %338 : vector<8x1xf32>
    %340 = vector.broadcast %339 : vector<8x1xf32> to vector<8x8xf32>
    %341 = arith.divf %335, %340 : vector<8x8xf32>
    %342 = vector.extract_strided_slice %256 {offsets = [0, 64], sizes = [8, 32], strides = [1, 1]} : vector<8x192xf32> to vector<8x32xf32>
    %cst_131 = arith.constant dense<0.000000e+00> : vector<8x32xf32>
    %343 = tpu.matmul %341, %342, %cst_131 {dimension_numbers = #tpu.dot_dimension_numbers<[1], [0], [0], [1], [0, 0, 1, 1], [], []>} : vector<8x8xf32>, vector<8x32xf32>, vector<8x32xf32> -> vector<8x32xf32>
    %c2_132 = arith.constant 2 : index
    %c0_133 = arith.constant 0 : index
    %344 = vector.load %arg14[%c2_132, %c0_133] : memref<6x32xf32, #tpu.memory_space<vmem>>, vector<1x32xf32>
    %345 = vector.broadcast %344 : vector<1x32xf32> to vector<8x32xf32>
    %346 = arith.addf %343, %345 : vector<8x32xf32>
    %347 = arith.addf %318, %346 : vector<8x32xf32>
    %348 = vector.extract_strided_slice %260 {offsets = [0, 3], sizes = [8, 1], strides = [1, 1]} : vector<8x6xf32> to vector<8x1xf32>
    %349 = vector.extract_strided_slice %261 {offsets = [3, 0], sizes = [1, 8], strides = [1, 1]} : vector<6x8xf32> to vector<1x8xf32>
    %350 = vector.broadcast %348 : vector<8x1xf32> to vector<8x8xf32>
    %351 = vector.broadcast %349 : vector<1x8xf32> to vector<8x8xf32>
    %352 = arith.addf %350, %351 : vector<8x8xf32>
    %cst_134 = arith.constant 0.000000e+00 : f32
    %353 = vector.broadcast %cst_134 : f32 to vector<8x8xf32>
    %354 = arith.cmpf oge, %352, %353 : vector<8x8xf32>
    %cst_135 = arith.constant 2.000000e-01 : f32
    %355 = vector.broadcast %cst_135 : f32 to vector<8x8xf32>
    %356 = arith.mulf %355, %352 : vector<8x8xf32>
    %357 = arith.select %354, %352, %356 : vector<8x8xi1>, vector<8x8xf32>
    %358 = arith.addf %357, %5 : vector<8x8xf32>
    %cst_136 = arith.constant dense<0xFF800000> : vector<8xf32>
    %359 = vector.multi_reduction <maximumf>, %358, %cst_136 [1] : vector<8x8xf32> to vector<8xf32>
    %360 = vector.shape_cast %359 : vector<8xf32> to vector<8x1xf32>
    %361 = vector.broadcast %360 : vector<8x1xf32> to vector<8x8xf32>
    %362 = arith.subf %358, %361 : vector<8x8xf32>
    %363 = math.exp %362 : vector<8x8xf32>
    %364 = arith.mulf %363, %0 : vector<8x8xf32>
    %cst_137 = arith.constant dense<0.000000e+00> : vector<8xf32>
    %365 = vector.multi_reduction <add>, %364, %cst_137 [1] : vector<8x8xf32> to vector<8xf32>
    %366 = vector.shape_cast %365 : vector<8xf32> to vector<8x1xf32>
    %cst_138 = arith.constant 9.99999968E-21 : f32
    %367 = vector.broadcast %cst_138 : f32 to vector<8x1xf32>
    %368 = arith.maximumf %366, %367 : vector<8x1xf32>
    %369 = vector.broadcast %368 : vector<8x1xf32> to vector<8x8xf32>
    %370 = arith.divf %364, %369 : vector<8x8xf32>
    %371 = vector.extract_strided_slice %256 {offsets = [0, 96], sizes = [8, 32], strides = [1, 1]} : vector<8x192xf32> to vector<8x32xf32>
    %cst_139 = arith.constant dense<0.000000e+00> : vector<8x32xf32>
    %372 = tpu.matmul %370, %371, %cst_139 {dimension_numbers = #tpu.dot_dimension_numbers<[1], [0], [0], [1], [0, 0, 1, 1], [], []>} : vector<8x8xf32>, vector<8x32xf32>, vector<8x32xf32> -> vector<8x32xf32>
    %c3_140 = arith.constant 3 : index
    %c0_141 = arith.constant 0 : index
    %373 = vector.load %arg14[%c3_140, %c0_141] : memref<6x32xf32, #tpu.memory_space<vmem>>, vector<1x32xf32>
    %374 = vector.broadcast %373 : vector<1x32xf32> to vector<8x32xf32>
    %375 = arith.addf %372, %374 : vector<8x32xf32>
    %376 = arith.addf %347, %375 : vector<8x32xf32>
    %377 = vector.extract_strided_slice %260 {offsets = [0, 4], sizes = [8, 1], strides = [1, 1]} : vector<8x6xf32> to vector<8x1xf32>
    %378 = vector.extract_strided_slice %261 {offsets = [4, 0], sizes = [1, 8], strides = [1, 1]} : vector<6x8xf32> to vector<1x8xf32>
    %379 = vector.broadcast %377 : vector<8x1xf32> to vector<8x8xf32>
    %380 = vector.broadcast %378 : vector<1x8xf32> to vector<8x8xf32>
    %381 = arith.addf %379, %380 : vector<8x8xf32>
    %cst_142 = arith.constant 0.000000e+00 : f32
    %382 = vector.broadcast %cst_142 : f32 to vector<8x8xf32>
    %383 = arith.cmpf oge, %381, %382 : vector<8x8xf32>
    %cst_143 = arith.constant 2.000000e-01 : f32
    %384 = vector.broadcast %cst_143 : f32 to vector<8x8xf32>
    %385 = arith.mulf %384, %381 : vector<8x8xf32>
    %386 = arith.select %383, %381, %385 : vector<8x8xi1>, vector<8x8xf32>
    %387 = arith.addf %386, %5 : vector<8x8xf32>
    %cst_144 = arith.constant dense<0xFF800000> : vector<8xf32>
    %388 = vector.multi_reduction <maximumf>, %387, %cst_144 [1] : vector<8x8xf32> to vector<8xf32>
    %389 = vector.shape_cast %388 : vector<8xf32> to vector<8x1xf32>
    %390 = vector.broadcast %389 : vector<8x1xf32> to vector<8x8xf32>
    %391 = arith.subf %387, %390 : vector<8x8xf32>
    %392 = math.exp %391 : vector<8x8xf32>
    %393 = arith.mulf %392, %0 : vector<8x8xf32>
    %cst_145 = arith.constant dense<0.000000e+00> : vector<8xf32>
    %394 = vector.multi_reduction <add>, %393, %cst_145 [1] : vector<8x8xf32> to vector<8xf32>
    %395 = vector.shape_cast %394 : vector<8xf32> to vector<8x1xf32>
    %cst_146 = arith.constant 9.99999968E-21 : f32
    %396 = vector.broadcast %cst_146 : f32 to vector<8x1xf32>
    %397 = arith.maximumf %395, %396 : vector<8x1xf32>
    %398 = vector.broadcast %397 : vector<8x1xf32> to vector<8x8xf32>
    %399 = arith.divf %393, %398 : vector<8x8xf32>
    %400 = vector.extract_strided_slice %256 {offsets = [0, 128], sizes = [8, 32], strides = [1, 1]} : vector<8x192xf32> to vector<8x32xf32>
    %cst_147 = arith.constant dense<0.000000e+00> : vector<8x32xf32>
    %401 = tpu.matmul %399, %400, %cst_147 {dimension_numbers = #tpu.dot_dimension_numbers<[1], [0], [0], [1], [0, 0, 1, 1], [], []>} : vector<8x8xf32>, vector<8x32xf32>, vector<8x32xf32> -> vector<8x32xf32>
    %c4 = arith.constant 4 : index
    %c0_148 = arith.constant 0 : index
    %402 = vector.load %arg14[%c4, %c0_148] : memref<6x32xf32, #tpu.memory_space<vmem>>, vector<1x32xf32>
    %403 = vector.broadcast %402 : vector<1x32xf32> to vector<8x32xf32>
    %404 = arith.addf %401, %403 : vector<8x32xf32>
    %405 = arith.addf %376, %404 : vector<8x32xf32>
    %406 = vector.extract_strided_slice %260 {offsets = [0, 5], sizes = [8, 1], strides = [1, 1]} : vector<8x6xf32> to vector<8x1xf32>
    %407 = vector.extract_strided_slice %261 {offsets = [5, 0], sizes = [1, 8], strides = [1, 1]} : vector<6x8xf32> to vector<1x8xf32>
    %408 = vector.broadcast %406 : vector<8x1xf32> to vector<8x8xf32>
    %409 = vector.broadcast %407 : vector<1x8xf32> to vector<8x8xf32>
    %410 = arith.addf %408, %409 : vector<8x8xf32>
    %cst_149 = arith.constant 0.000000e+00 : f32
    %411 = vector.broadcast %cst_149 : f32 to vector<8x8xf32>
    %412 = arith.cmpf oge, %410, %411 : vector<8x8xf32>
    %cst_150 = arith.constant 2.000000e-01 : f32
    %413 = vector.broadcast %cst_150 : f32 to vector<8x8xf32>
    %414 = arith.mulf %413, %410 : vector<8x8xf32>
    %415 = arith.select %412, %410, %414 : vector<8x8xi1>, vector<8x8xf32>
    %416 = arith.addf %415, %5 : vector<8x8xf32>
    %cst_151 = arith.constant dense<0xFF800000> : vector<8xf32>
    %417 = vector.multi_reduction <maximumf>, %416, %cst_151 [1] : vector<8x8xf32> to vector<8xf32>
    %418 = vector.shape_cast %417 : vector<8xf32> to vector<8x1xf32>
    %419 = vector.broadcast %418 : vector<8x1xf32> to vector<8x8xf32>
    %420 = arith.subf %416, %419 : vector<8x8xf32>
    %421 = math.exp %420 : vector<8x8xf32>
    %422 = arith.mulf %421, %0 : vector<8x8xf32>
    %cst_152 = arith.constant dense<0.000000e+00> : vector<8xf32>
    %423 = vector.multi_reduction <add>, %422, %cst_152 [1] : vector<8x8xf32> to vector<8xf32>
    %424 = vector.shape_cast %423 : vector<8xf32> to vector<8x1xf32>
    %cst_153 = arith.constant 9.99999968E-21 : f32
    %425 = vector.broadcast %cst_153 : f32 to vector<8x1xf32>
    %426 = arith.maximumf %424, %425 : vector<8x1xf32>
    %427 = vector.broadcast %426 : vector<8x1xf32> to vector<8x8xf32>
    %428 = arith.divf %422, %427 : vector<8x8xf32>
    %429 = vector.extract_strided_slice %256 {offsets = [0, 160], sizes = [8, 32], strides = [1, 1]} : vector<8x192xf32> to vector<8x32xf32>
    %cst_154 = arith.constant dense<0.000000e+00> : vector<8x32xf32>
    %430 = tpu.matmul %428, %429, %cst_154 {dimension_numbers = #tpu.dot_dimension_numbers<[1], [0], [0], [1], [0, 0, 1, 1], [], []>} : vector<8x8xf32>, vector<8x32xf32>, vector<8x32xf32> -> vector<8x32xf32>
    %c5 = arith.constant 5 : index
    %c0_155 = arith.constant 0 : index
    %431 = vector.load %arg14[%c5, %c0_155] : memref<6x32xf32, #tpu.memory_space<vmem>>, vector<1x32xf32>
    %432 = vector.broadcast %431 : vector<1x32xf32> to vector<8x32xf32>
    %433 = arith.addf %430, %432 : vector<8x32xf32>
    %434 = arith.addf %405, %433 : vector<8x32xf32>
    %cst_156 = arith.constant 6.000000e+00 : f32
    %435 = vector.broadcast %cst_156 : f32 to vector<8x32xf32>
    %436 = arith.divf %434, %435 : vector<8x32xf32>
    %c0_157 = arith.constant 0 : index
    %c0_158 = arith.constant 0 : index
    %437 = vector.load %arg15[%c0_157, %c0_158] : memref<8x32xf32, #tpu.memory_space<vmem>>, vector<8x32xf32>
    tpu.vector_store %arg15[%c0_157, %c0_158], %436 {strides = array<i32>} : memref<8x32xf32, #tpu.memory_space<vmem>>, vector<8x32xf32>,
    return
  }
  func.func @transform_0(%arg0: i32) -> (i32, i32) {
    %c0_i32 = arith.constant 0 : i32
    %c0_i32_0 = arith.constant 0 : i32
    %c0_i32_1 = arith.constant 0 : i32
    return %c0_i32, %c0_i32_0 : i32, i32
  }
  func.func @transform_1(%arg0: i32) -> (i32, i32) {
    %c0_i32 = arith.constant 0 : i32
    %c0_i32_0 = arith.constant 0 : i32
    %c0_i32_1 = arith.constant 0 : i32
    return %c0_i32, %c0_i32_0 : i32, i32
  }
  func.func @transform_2(%arg0: i32) -> (i32, i32) {
    %c0_i32 = arith.constant 0 : i32
    %c0_i32_0 = arith.constant 0 : i32
    %c0_i32_1 = arith.constant 0 : i32
    return %c0_i32, %c0_i32_0 : i32, i32
  }
  func.func @transform_3(%arg0: i32) -> (i32, i32) {
    %c0_i32 = arith.constant 0 : i32
    %c0_i32_0 = arith.constant 0 : i32
    %c0_i32_1 = arith.constant 0 : i32
    return %c0_i32, %c0_i32_0 : i32, i32
  }
  func.func @transform_4(%arg0: i32) -> (i32, i32) {
    %c0_i32 = arith.constant 0 : i32
    %c0_i32_0 = arith.constant 0 : i32
    %c0_i32_1 = arith.constant 0 : i32
    return %c0_i32, %c0_i32_0 : i32, i32
  }
  func.func @transform_5(%arg0: i32) -> (i32, i32) {
    %c0_i32 = arith.constant 0 : i32
    %c0_i32_0 = arith.constant 0 : i32
    %c0_i32_1 = arith.constant 0 : i32
    return %c0_i32, %c0_i32_0 : i32, i32
  }
  func.func @transform_6(%arg0: i32) -> (i32, i32) {
    %c0_i32 = arith.constant 0 : i32
    %c0_i32_0 = arith.constant 0 : i32
    %c0_i32_1 = arith.constant 0 : i32
    return %c0_i32, %c0_i32_0 : i32, i32
  }
  func.func @transform_7(%arg0: i32) -> (i32, i32) {
    %c0_i32 = arith.constant 0 : i32
    %c0_i32_0 = arith.constant 0 : i32
    %c0_i32_1 = arith.constant 0 : i32
    return %c0_i32, %c0_i32_0 : i32, i32
  }
  func.func @transform_8(%arg0: i32) -> (i32, i32) {
    %c0_i32 = arith.constant 0 : i32
    %c0_i32_0 = arith.constant 0 : i32
    %c0_i32_1 = arith.constant 0 : i32
    return %c0_i32, %c0_i32_0 : i32, i32
  }
  func.func @transform_9(%arg0: i32) -> (i32, i32) {
    %c0_i32 = arith.constant 0 : i32
    %c0_i32_0 = arith.constant 0 : i32
    %c0_i32_1 = arith.constant 0 : i32
    return %c0_i32, %c0_i32_0 : i32, i32
  }
  func.func @transform_10(%arg0: i32) -> (i32, i32) {
    %c0_i32 = arith.constant 0 : i32
    %c0_i32_0 = arith.constant 0 : i32
    %c0_i32_1 = arith.constant 0 : i32
    return %c0_i32, %c0_i32_0 : i32, i32
  }
  func.func @transform_11(%arg0: i32) -> (i32, i32) {
    %c0_i32 = arith.constant 0 : i32
    %c0_i32_0 = arith.constant 0 : i32
    %c0_i32_1 = arith.constant 0 : i32
    return %c0_i32, %c0_i32_0 : i32, i32
  }
  func.func @transform_12(%arg0: i32) -> (i32, i32) {
    %c0_i32 = arith.constant 0 : i32
    %c0_i32_0 = arith.constant 0 : i32
    %c0_i32_1 = arith.constant 0 : i32
    return %c0_i32, %c0_i32_0 : i32, i32
  }
  func.func @transform_13(%arg0: i32) -> (i32, i32) {
    %c0_i32 = arith.constant 0 : i32
    %c0_i32_0 = arith.constant 0 : i32
    %c0_i32_1 = arith.constant 0 : i32
    return %c0_i32, %c0_i32_0 : i32, i32
  }
  func.func @transform_14(%arg0: i32) -> (i32, i32) {
    %c0_i32 = arith.constant 0 : i32
    %c0_i32_0 = arith.constant 0 : i32
    %c0_i32_1 = arith.constant 0 : i32
    return %c0_i32, %c0_i32_0 : i32, i32
  }
}

</mosaic_0001>

<bundles_post_ra>
// kernel: tpu_custom_call.1
= control target key start
LH: loop header
LB: loop body
LE: loop exit
PB: predicated region body
PF: predicated region fallthrough
CT: control target
= control target key end

     0   :  { %v3390_v7 = vmov 0.0   ;;  %vm70_vm0 = vcmask 1041408   ;;  %vm66_vm1 = vcmask 408576   ;;  %s4731_s0 = inlined_call_operand.vmem [shape: f32[8,50], index: 0, kind: input, shape index: {}]   ;;  %s4732_s1 = inlined_call_operand.vmem [shape: f32[8,8], index: 1, kind: input, shape index: {}]   ;;  %s4733_s2 = inlined_call_operand.vmem [shape: f32[50,256], index: 2, kind: input, shape index: {}]   ;;  %s4734_s3 = inlined_call_operand.vmem [shape: f32[256,4], index: 3, kind: input, shape index: {}]   ;;  %s4735_s4 = inlined_call_operand.vmem [shape: f32[256,4], index: 4, kind: input, shape index: {}]   ;;  %s4736_s5 = inlined_call_operand.vmem [shape: f32[4,64], index: 5, kind: input, shape index: {}]   ;;  %s4737_s6 = inlined_call_operand.vmem [shape: f32[256,256], index: 6, kind: input, shape index: {}]   ;;  %s4738_s7 = inlined_call_operand.vmem [shape: f32[256,4], index: 7, kind: input, shape index: {}]   ;;  %s4739_s8 = inlined_call_operand.vmem [shape: f32[256,4], index: 8, kind: input, shape index: {}]   ;;  %s4740_s9 = inlined_call_operand.vmem [shape: f32[4,64], index: 9, kind: input, shape index: {}]   ;;  %s4741_s10 = inlined_call_operand.vmem [shape: f32[256,192], index: 10, kind: input, shape index: {}]   ;;  %s4742_s11 = inlined_call_operand.vmem [shape: f32[192,6], index: 11, kind: input, shape index: {}]   ;;  %s4743_s12 = inlined_call_operand.vmem [shape: f32[192,6], index: 12, kind: input, shape index: {}]   ;;  %s4744_s13 = inlined_call_operand.vmem [shape: f32[6,32], index: 13, kind: input, shape index: {}]   ;;  %s4745_s14 = inlined_call_operand.hbm [shape: f32[8,32], index: 14, kind: output, shape index: {}]  }
   0x1   :  { %v53_v0 = vld [vmem:[%s4733_s2 + $0x8] sm:$0xff]  ;;  %v55_v1 = vld [vmem:[%s4733_s2 + $0x18] sm:$0xff]  ;;  %v52_v2 = vld [vmem:[%s4733_s2] sm:$0xff]  ;;  %141 = vmatprep.mubr.f32.mxu0 %v3390_v7 }
   0x2   :  { %v2926_v3 = vpack.c.bf16 %v55_v1, %v53_v0  ;;  %v54_v4 = vld [vmem:[%s4733_s2 + $0x10] sm:$0xff]  ;;  %v57_v5 = vld [vmem:[%s4733_s2 + $0x28] sm:$0xff]  ;;  %v59_v6 = vld [vmem:[%s4733_s2 + $0x38] sm:$0xff] }
   0x3   :  { %v2928_v8 = vpack.c.bf16 %v54_v4, %v52_v2  ;;  %v2930_v9 = vpack.c.bf16 %v59_v6, %v57_v5  ;;  %v56_v10 = vld [vmem:[%s4733_s2 + $0x20] sm:$0xff]  ;;  %v58_v11 = vld [vmem:[%s4733_s2 + $0x30] sm:$0xff]  ;;  %v61_v12 = vld [vmem:[%s4733_s2 + $0x48] sm:$0xff] }
   0x4   :  { %2927 = vmatprep.subr.bf16.mxu0 %v2926_v3  ;;  %v63_v13 = vld [vmem:[%s4733_s2 + $0x58] sm:$0xff]  ;;  %v2932_v14 = vpack.c.bf16 %v58_v11, %v56_v10  ;;  %v60_v16 = vld [vmem:[%s4733_s2 + $0x40] sm:$0xff]  ;;  %v62_v17 = vld [vmem:[%s4733_s2 + $0x50] sm:$0xff] }
   0x5   :  { %2929 = vmatpush1.bf16.msra.mxu0 %v2928_v8  ;;  %v2934_v15 = vpack.c.bf16 %v63_v13, %v61_v12  ;;  %v164_v18 = vld [vmem:[%s4734_s3 + $0x80] sm:$0xff]  ;;  %v165_v19 = vld [vmem:[%s4734_s3 + $0x88] sm:$0xff]  ;;  %v2936_v23 = vpack.c.bf16 %v62_v17, %v60_v16  ;;  %v166_v26 = vld [vmem:[%s4734_s3 + $0x90] sm:$0xff] }
   0x6   :  { %2931 = vmatprep.subr.bf16.mxu0 %v2930_v9  ;;  %v2938_v20 = vpack.c.bf16 %v165_v19, %v164_v18  ;;  %v148_v21 = vld [vmem:[%s4734_s3] sm:$0xff]  ;;  %v149_v22 = vld [vmem:[%s4734_s3 + $0x8] sm:$0xff]  ;;  %v167_v27 = vld [vmem:[%s4734_s3 + $0x98] sm:$0xff] }
   0x7   :  { %v65_v24 = vld [vmem:[%s4733_s2 + $0x68] sm:$0x3]  ;;  %v2940_v25 = vpack.c.bf16 %v149_v22, %v148_v21  ;;  %v266_v28 = vld [vmem:[%s4735_s4 + $0x80] sm:$0xff]  ;;  %v2942_v30 = vpack.c.bf16 %v167_v27, %v166_v26  ;;  %v150_v31 = vld [vmem:[%s4734_s3 + $0x10] sm:$0xff] }
   0x8   :  { %v267_v29 = vld [vmem:[%s4735_s4 + $0x88] sm:$0xff]  ;;  %2939 = vmatprep.subr.bf16.mxu1 %v2938_v20  ;;  %v250_v32 = vld [vmem:[%s4735_s4] sm:$0xff]  ;;  %v151_v34 = vld [vmem:[%s4734_s3 + $0x18] sm:$0xff] }
   0x9   :  { %2933 = vmatpush1.bf16.msra.mxu0 %v2932_v14  ;;  %v251_v33 = vld [vmem:[%s4735_s4 + $0x8] sm:$0xff]  ;;  %2941 = vmatpush3.bf16.msra.mxu1 %v2940_v25  ;;  %v268_v35 = vld [vmem:[%s4735_s4 + $0x90] sm:$0xff]  ;;  %v2944_v36 = vpack.c.bf16 %v151_v34, %v150_v31  ;;  %v168_v37 = vld [vmem:[%s4734_s3 + $0xa0] sm:$0xff]  ;;  %v2970_v45 = vpack.c.bf16 %v267_v29, %v266_v28 }
   0xa   :  { %2935 = vmatprep.subr.bf16.mxu0 %v2934_v15  ;;  %2943 = vmatprep.subr.bf16.mxu1 %v2942_v30  ;;  %v169_v38 = vld [vmem:[%s4734_s3 + $0xa8] sm:$0xff]  ;;  %v269_v39 = vld [vmem:[%s4735_s4 + $0x98] sm:$0xff]  ;;  %v152_v41 = vld [vmem:[%s4734_s3 + $0x20] sm:$0xff]  ;;  %v2972_v47 = vpack.c.bf16 %v251_v33, %v250_v32 }
   0xb   :  { %v2946_v40 = vpack.c.bf16 %v169_v38, %v168_v37  ;;  %v153_v42 = vld [vmem:[%s4734_s3 + $0x28] sm:$0xff]  ;;  %v64_v43 = vld [vmem:[%s4733_s2 + $0x60] sm:$0x3]  ;;  %v170_v46 = vld [vmem:[%s4734_s3 + $0xb0] sm:$0xff]  ;;  %v2974_v52 = vpack.c.bf16 %v269_v39, %v268_v35 }
   0xc   :  { %v51_v44 = vld [vmem:[%s4731_s0] sm:$0xff]  ;;  %v252_v48 = vld [vmem:[%s4735_s4 + $0x10] sm:$0xff]  ;;  %v253_v49 = vld [vmem:[%s4735_s4 + $0x18] sm:$0xff]  ;;  %v2948_v50 = vpack.c.bf16 %v153_v42, %v152_v41 }
   0xd   :  { %2937 = vmatpush1.bf16.msra.mxu0 %v2936_v23  ;;  %2945 = vmatpush3.bf16.msra.mxu1 %v2944_v36  ;;  %v171_v51 = vld [vmem:[%s4734_s3 + $0xb8] sm:$0xff]  ;;  %v270_v53 = vld [vmem:[%s4735_s4 + $0xa0] sm:$0xff]  ;;  %v154_v55 = vld [vmem:[%s4734_s3 + $0x30] sm:$0xff]  ;;  %v2976_v60 = vpack.c.bf16 %v253_v49, %v252_v48 }
   0xe   :  { %2655 = vmatprep.subr.msk.mxu0 %vm70_vm0, %v65_v24  ;;  %2947 = vmatprep.subr.bf16.mxu1 %v2946_v40  ;;  %v2950_v54 = vpack.c.bf16 %v171_v51, %v170_v46  ;;  %v155_v56 = vld [vmem:[%s4734_s3 + $0x38] sm:$0xff]  ;;  %v271_v57 = vld [vmem:[%s4735_s4 + $0xa8] sm:$0xff]  ;;  %v172_v58 = vld [vmem:[%s4734_s3 + $0xc0] sm:$0xff] }
   0xf   :  { %v173_v59 = vld [vmem:[%s4734_s3 + $0xc8] sm:$0xff]  ;;  %v254_v61 = vld [vmem:[%s4735_s4 + $0x20] sm:$0xff]  ;;  %v2952_v63 = vpack.c.bf16 %v155_v56, %v154_v55  ;;  %v2978_v0 = vpack.c.bf16 %v271_v57, %v270_v53  ;;  %v272_v1 = vld [vmem:[%s4735_s4 + $0xb0] sm:$0xff] }
  0x10   :  { %v255_v62 = vld [vmem:[%s4735_s4 + $0x28] sm:$0xff]  ;;  %v2954_v2 = vpack.c.bf16 %v173_v59, %v172_v58  ;;  %v156_v3 = vld [vmem:[%s4734_s3 + $0x40] sm:$0xff]  ;;  %v273_v5 = vld [vmem:[%s4735_s4 + $0xb8] sm:$0xff] }
  0x11   :  { %2656 = vmatpush1.msk.msra.mxu0 %vm70_vm0, %v64_v43  ;;  %2949 = vmatpush3.bf16.msra.mxu1 %v2948_v50  ;;  %v157_v4 = vld [vmem:[%s4734_s3 + $0x48] sm:$0xff]  ;;  %v174_v6 = vld [vmem:[%s4734_s3 + $0xd0] sm:$0xff]  ;;  %v175_v8 = vld [vmem:[%s4734_s3 + $0xd8] sm:$0xff]  ;;  %v2980_v9 = vpack.c.bf16 %v255_v62, %v254_v61  ;;  %v2982_v13 = vpack.c.bf16 %v273_v5, %v272_v1 }
  0x12   :  { %2657 = vmatmul.mubr.msk.f32.vlgmr.msra.gmra.mrb[0].mxu0 %vm66_vm1, %v51_v44  ;;  %2971 = vmatprep.subr.bf16.mxu0 %v2970_v45  ;;  %v256_v10 = vld [vmem:[%s4735_s4 + $0x30] sm:$0xff]  ;;  %v257_v11 = vld [vmem:[%s4735_s4 + $0x38] sm:$0xff]  ;;  %v2956_v12 = vpack.c.bf16 %v157_v4, %v156_v3  ;;  %v274_v14 = vld [vmem:[%s4735_s4 + $0xc0] sm:$0xff]  ;;  %v2958_v15 = vpack.c.bf16 %v175_v8, %v174_v6 }
  0x13   :  { %2973 = vmatpush3.bf16.msra.mxu0 %v2972_v47  ;;  %2951 = vmatprep.subr.bf16.mxu1 %v2950_v54  ;;  %v158_v16 = vld [vmem:[%s4734_s3 + $0x50] sm:$0xff]  ;;  %v159_v17 = vld [vmem:[%s4734_s3 + $0x58] sm:$0xff]  ;;  %v275_v18 = vld [vmem:[%s4735_s4 + $0xc8] sm:$0xff] }
  0x14   :  { %2975 = vmatprep.subr.bf16.mxu0 %v2974_v52  ;;  %v176_v19 = vld [vmem:[%s4734_s3 + $0xe0] sm:$0xff]  ;;  %v177_v20 = vld [vmem:[%s4734_s3 + $0xe8] sm:$0xff] }
  0x15   :  { %2953 = vmatpush3.bf16.msra.mxu1 %v2952_v63 }
  0x16   :  { %2955 = vmatprep.subr.bf16.mxu1 %v2954_v2 }
  0x17   :  { %2977 = vmatpush3.bf16.msra.mxu0 %v2976_v60 }
  0x18   :  { %2979 = vmatprep.subr.bf16.mxu0 %v2978_v0 }
  0x19   :  { %19 = vsyncpa [#allocation5], 0  ;;  %v2984_v21 = vpack.c.bf16 %v257_v11, %v256_v10  ;;  %v258_v22 = vld [vmem:[%s4735_s4 + $0x40] sm:$0xff]  ;;  %v259_v23 = vld [vmem:[%s4735_s4 + $0x48] sm:$0xff]  ;;  %2957 = vmatpush3.bf16.msra.mxu1 %v2956_v12  ;;  %v2960_v24 = vpack.c.bf16 %v159_v17, %v158_v16  ;;  %v2986_v25 = vpack.c.bf16 %v275_v18, %v274_v14  ;;  %v2962_v27 = vpack.c.bf16 %v177_v20, %v176_v19  ;;  %s3396_s17 = smov 64  }
  0x1a   :  { %v276_v26 = vld [vmem:[%s4735_s4 + $0xd0] sm:$0xff]  ;;  %2959 = vmatprep.subr.bf16.mxu1 %v2958_v15  ;;  %v160_v28 = vld [vmem:[%s4734_s3 + $0x60] sm:$0xff]  ;;  %v161_v29 = vld [vmem:[%s4734_s3 + $0x68] sm:$0xff]  ;;  %v2988_v33 = vpack.c.bf16 %v259_v23, %v258_v22  ;;  %v3391_v57 = vmov 3   ;;  %v3392_v58 = vmov 1   ;;  %v3393_v1 = vmov 2  }
  0x1b   :  { %2981 = vmatpush3.bf16.msra.mxu0 %v2980_v9  ;;  %v277_v30 = vld [vmem:[%s4735_s4 + $0xd8] sm:$0xff]  ;;  %v178_v31 = vld [vmem:[%s4734_s3 + $0xf0] sm:$0xff]  ;;  %v2964_v34 = vpack.c.bf16 %v161_v29, %v160_v28  ;;  %v278_v39 = vld [vmem:[%s4735_s4 + $0xe0] sm:$0xff]  ;;  %3298 = vset.pattern.permute.xlu1 %v3391_v57  ;;  %v3394_v2 = vmov 0   ;;  %v389_v3 = vlaneseq  ;;  %vm398_vm6 = vcmask 64512  }
  0x1c   :  { %2983 = vmatprep.subr.bf16.mxu0 %v2982_v13  ;;  %v179_v32 = vld [vmem:[%s4734_s3 + $0xf8] sm:$0xff]  ;;  %v2990_v35 = vpack.c.bf16 %v277_v30, %v276_v26  ;;  %v260_v36 = vld [vmem:[%s4735_s4 + $0x50] sm:$0xff]  ;;  %v279_v40 = vld [vmem:[%s4735_s4 + $0xe8] sm:$0xff]  ;;  %3296 = vset.pattern.permute.xlu0 %v3392_v58  ;;  %vm3397_vm8 = vmmov 0   ;;  %vm490_vm9 = vcmask 523264   ;;  %vm604_vm10 = vcmask 1048064  }
  0x1d   :  { %2961 = vmatpush3.bf16.msra.mxu1 %v2960_v24  ;;  %v261_v37 = vld [vmem:[%s4735_s4 + $0x58] sm:$0xff]  ;;  %v2966_v38 = vpack.c.bf16 %v179_v32, %v178_v31  ;;  %v2994_v42 = vpack.c.bf16 %v279_v40, %v278_v39  ;;  %v262_v43 = vld [vmem:[%s4735_s4 + $0x60] sm:$0xff]  ;;  %v263_v44 = vld [vmem:[%s4735_s4 + $0x68] sm:$0xff]  ;;  %v3736_v5 = vshrl.u32 %v389_v3, 7  ;;  %v3395_v24 = vmov -1e+30  }
  0x1e   :  { %2963 = vmatprep.subr.bf16.mxu1 %v2962_v27  ;;  %v2992_v41 = vpack.c.bf16 %v261_v37, %v260_v36  ;;  %v280_v45 = vld [vmem:[%s4735_s4 + $0xf0] sm:$0xff]  ;;  %v281_v46 = vld [vmem:[%s4735_s4 + $0xf8] sm:$0xff]  ;;  %v2996_v47 = vpack.c.bf16 %v263_v44, %v262_v43  ;;  %v3753_v13 = vld [vmem:[%s4732_s1] sm:$0xff] }
  0x1f   :  { %2985 = vmatpush3.bf16.msra.mxu0 %v2984_v21  ;;  %v2998_v48 = vpack.c.bf16 %v281_v46, %v280_v45  ;;  %v264_v49 = vld [vmem:[%s4735_s4 + $0x70] sm:$0xff]  ;;  %v265_v50 = vld [vmem:[%s4735_s4 + $0x78] sm:$0xff]  ;;  %v3739_v9 = vsub.s32 0, %v3736_v5  ;;  %v3742_v10 = vsub.s32 1, %v3736_v5  ;;  %v3745_v11 = vsub.s32 2, %v3736_v5  ;;  %s3402_s4 = smov 96  }
  0x20   :  { %2987 = vmatprep.subr.bf16.mxu0 %v2986_v25  ;;  %v3000_v51 = vpack.c.bf16 %v265_v50, %v264_v49  ;;  %v162_v52 = vld [vmem:[%s4734_s3 + $0x70] sm:$0xff]  ;;  %v163_v53 = vld [vmem:[%s4734_s3 + $0x78] sm:$0xff]  ;;  %v3748_v12 = vsub.s32 3, %v3736_v5  ;;  %vm49_vm2 = vcmp.gt.f32.partialorder %v3753_v13, 0.0 }
  0x21   :  { %2965 = vmatpush3.bf16.msra.mxu1 %v2964_v34  ;;  %v2968_v54 = vpack.c.bf16 %v163_v53, %v162_v52  ;;  %v3760_v25 = vsel %vm49_vm2, 0.0, %v3395_v24 }
  0x22   :  { %2967 = vmatprep.subr.bf16.mxu1 %v2966_v38 }
  0x23   :  { %2989 = vmatpush3.bf16.msra.mxu0 %v2988_v33 }
  0x24   :  { %2991 = vmatprep.subr.bf16.mxu0 %v2990_v35 }
  0x25   :  { %2969 = vmatpush3.bf16.msra.mxu1 %v2968_v54 }
  0x26   :  { %2861 = vmatprep.subr.mxu1 %v3390_v7 }
  0x27   :  { %2993 = vmatpush3.bf16.msra.mxu0 %v2992_v41 }
  0x28   :  { %2995 = vmatprep.subr.bf16.mxu0 %v2994_v42 }
  0x2b   :  { %2997 = vmatpush3.bf16.msra.mxu0 %v2996_v47 }
  0x2c   :  { %2999 = vmatprep.subr.bf16.mxu0 %v2998_v48 }
  0x2f   :  { %3001 = vmatpush3.bf16.msra.mxu0 %v3000_v51 }
  0x30   :  { %2856 = vmatprep.subr.mxu0 %v3390_v7 }
  0xe5   :  { %v3722_v55 = vpop.f32.mrb[0].mxu0 }
  0xe6   :  { %v3724_v56 = vpop.f32.mrb[1].mxu0 }
  0xe7   :  { %244 = vmatprep.mubr.f32.mxu1 %v3724_v56  ;;  %346 = vmatprep.mubr.f32.mxu0 %v3724_v56 }
  0xe8   :  { %245 = vmatmul.mubr.f32.vlgmr.msra.gmra.mrb[0].mxu1 %v3722_v55  ;;  %347 = vmatmul.mubr.f32.vlgmr.msra.gmra.mrb[2].mxu0 %v3722_v55 }
  0xe9   :  { %2857 = vmatpush3.msra.mxu0 %v3722_v55  ;;  %2863 = vmatprep.mubr.msk.f32.mxu1 %vm3397_vm8, %v3390_v7 }
  0xea   :  { %2858 = vmatprep.mubr.msk.f32.mxu0 %vm3397_vm8, %v3390_v7 }
 0x1bb   :  { %v2720_v59 = vpop.f32.mrb[0].mxu1  ;;  %v2755_v60 = vpop.f32.mrb[2].mxu0 }
 0x1bc   :  { %v2721_v61 = vpop.f32.mrb[1].mxu1  ;;  %v2756_v62 = vpop.f32.mrb[3].mxu0 }
 0x1bd   :  { %v2722_v63 = vadd.f32 %v2721_v61, %v2720_v59  ;;  %v2757_v0 = vadd.f32 %v2756_v62, %v2755_v60 }
 0x1bf   :  { %712 = vperm.xlu1 %3298, %v2757_v0   ;;  %493 = vperm.xlu0 %3296, %v2757_v0  }
 0x1c3   :  { %3297 = vset.pattern.permute.xlu0 %v3393_v1 }
 0x1c4   :  { %607 = vperm.xlu0 %3297, %v2757_v0  }
 0x1c8   :  { %3299 = vset.pattern.permute.xlu0 %v3394_v2 }
 0x1c9   :  { %386 = vperm.xlu0 %3299, %v2757_v0  }
 0x1e8   :  { %352 = vxpose.xlu1.b32.start.end [1/1] (short) (narrow) %v2722_v63, 8 }
 0x206   :  { %3300 = vset.pattern.permute.xlu1 %v3392_v58 }
 0x23e   :  { %v494_v4 = vpop.permute.xlu0 %493  ;;  %v713_v6 = vpop.permute.xlu1 %712 }
 0x243   :  { %v608_v8 = vpop.permute.xlu0 %607 }
 0x248   :  { %v387_v19 = vpop.permute.xlu0 %386 }
 0x268   :  { %v368_v14 = vpop.trf.xlu1 }
 0x269   :  { %v392_v15 = vrot.slane %v368_v14, %v3739_v9  ;;  %v499_v16 = vrot.slane %v368_v14, %v3742_v10  ;;  %v613_v17 = vrot.slane %v368_v14, %v3745_v11  ;;  %v718_v18 = vrot.slane %v368_v14, %v3748_v12 }
 0x26b   :  { %v393_v20 = vadd.f32 %v392_v15, %v387_v19  ;;  %v500_v21 = vadd.f32 %v499_v16, %v494_v4  ;;  %v614_v22 = vadd.f32 %v613_v17, %v608_v8  ;;  %v719_v23 = vadd.f32 %v718_v18, %v713_v6 }
 0x26d   :  { %vm615_vm3 = vcmp.ge.f32.partialorder %v614_v22, 0.0  ;;  %v616_v26 = vmul.f32 0.2, %v614_v22  ;;  %vm501_vm4 = vcmp.ge.f32.partialorder %v500_v21, 0.0  ;;  %v502_v27 = vmul.f32 0.2, %v500_v21 }
 0x26e   :  { %vm720_vm5 = vcmp.ge.f32.partialorder %v719_v23, 0.0  ;;  %v721_v28 = vmul.f32 0.2, %v719_v23  ;;  %v395_v31 = vmul.f32 0.2, %v393_v20  ;;  %vm394_vm7 = vcmp.ge.f32.partialorder %v393_v20, 0.0 }
 0x26f   :  { %v617_v29 = vsel %vm615_vm3, %v614_v22, %v616_v26  ;;  %v503_v30 = vsel %vm501_vm4, %v500_v21, %v502_v27 }
 0x270   :  { %v618_v32 = vadd.f32 %v617_v29, %v3760_v25  ;;  %v504_v33 = vadd.f32 %v503_v30, %v3760_v25  ;;  %v722_v34 = vsel %vm720_vm5, %v719_v23, %v721_v28  ;;  %v396_v38 = vsel %vm394_vm7, %v393_v20, %v395_v31 }
 0x271   :  { %v723_v37 = vadd.f32 %v722_v34, %v3760_v25  ;;  %v397_v40 = vadd.f32 %v396_v38, %v3760_v25  ;;  %v826_v34 = vld [vmem:[%s4737_s6] sm:$0xff]  ;;  %v833_v38 = vld [vmem:[%s4737_s6 + $0x38] sm:$0xff]  ;;  %vm2639_vm5 = vcmask 261120  }
 0x272   :  { %v619_v35 = vsel %vm398_vm6, %v618_v32, -inf  ;;  %v505_v36 = vsel %vm398_vm6, %v504_v33, -inf }
 0x273   :  { %620 = vmax.xlane.f32.xlu1 %v619_v35  ;;  %506 = vmax.xlane.f32.xlu0 %v505_v36  ;;  %v724_v39 = vsel %vm398_vm6, %v723_v37, -inf  ;;  %v399_v41 = vsel %vm398_vm6, %v397_v40, -inf  ;;  %v828_v36 = vld [vmem:[%s4737_s6 + $0x10] sm:$0xff] }
 0x277   :  { %725 = vmax.xlane.f32.xlu0 %v724_v39  ;;  %v3004_v39 = vpack.c.bf16 %v828_v36, %v826_v34  ;;  %v865_v34 = vld [vmem:[%s4737_s6 + $0x138] sm:$0xff] }
 0x27b   :  { %400 = vmax.xlane.f32.xlu0 %v399_v41  ;;  %v830_v41 = vld [vmem:[%s4737_s6 + $0x20] sm:$0xff] }
 0x284   :  { %743 = vrot.lane.b32.xlu1 %v3724_v56, %s3396_s17 }
 0x300   :  { %v621_v42 = vpop.xlane.xlu1 %620  ;;  %v507_v43 = vpop.xlane.xlu0 %506 }
 0x301   :  { %v622_v44 = vsub.f32 %v618_v32, %v621_v42  ;;  %v508_v45 = vsub.f32 %v504_v33, %v507_v43  ;;  %v827_v32 = vld [vmem:[%s4737_s6 + $0x8] sm:$0xff]  ;;  %v829_v33 = vld [vmem:[%s4737_s6 + $0x18] sm:$0xff]  ;;  %v832_v42 = vld [vmem:[%s4737_s6 + $0x30] sm:$0xff] }
 0x302   :  { %v3002_v35 = vpack.c.bf16 %v829_v33, %v827_v32  ;;  %v835_v43 = vld [vmem:[%s4737_s6 + $0x48] sm:$0xff]  ;;  %v860_v32 = vld [vmem:[%s4737_s6 + $0x110] sm:$0xff] }
 0x303   :  { %v623_v46 = vmul.f32 1.442695, %v622_v44  ;;  %v509_v47 = vmul.f32 1.442695, %v508_v45  ;;  %v837_v44 = vld [vmem:[%s4737_s6 + $0x58] sm:$0xff]  ;;  %v3008_v45 = vpack.c.bf16 %v832_v42, %v830_v41  ;;  %v863_v33 = vld [vmem:[%s4737_s6 + $0x128] sm:$0xff] }
 0x304   :  { %v726_v48 = vpop.xlane.xlu0 %725  ;;  %v744_v26 = vpop.permute.xlu1 %743  ;;  %3003 = vmatprep.subr.bf16.mxu0 %v3002_v35  ;;  %v3038_v36 = vpack.c.bf16 %v865_v34, %v863_v33 }
 0x305   :  { %3309 = vpow2.f32 %v623_v46  ;;  %v727_v49 = vsub.f32 %v723_v37, %v726_v48  ;;  %v831_v37 = vld [vmem:[%s4737_s6 + $0x28] sm:$0xff]  ;;  %v3010_v46 = vpack.c.bf16 %v837_v44, %v835_v43  ;;  %v836_v48 = vld [vmem:[%s4737_s6 + $0x50] sm:$0xff]  ;;  %v866_v43 = vld [vmem:[%s4737_s6 + $0x140] sm:$0xff] }
 0x306   :  { %3311 = vpow2.f32 %v509_v47  ;;  %v834_v47 = vld [vmem:[%s4737_s6 + $0x40] sm:$0xff]  ;;  %v868_v44 = vld [vmem:[%s4737_s6 + $0x150] sm:$0xff] }
 0x307   :  { %v728_v50 = vmul.f32 1.442695, %v727_v49  ;;  %v839_v49 = vld [vmem:[%s4737_s6 + $0x68] sm:$0xff] }
 0x308   :  { %v401_v0 = vpop.xlane.xlu0 %400 }
 0x309   :  { %3313 = vpow2.f32 %v728_v50  ;;  %v402_v3 = vsub.f32 %v397_v40, %v401_v0  ;;  %v3006_v40 = vpack.c.bf16 %v833_v38, %v831_v37  ;;  %v841_v50 = vld [vmem:[%s4737_s6 + $0x78] sm:$0xff]  ;;  %v844_v0 = vld [vmem:[%s4737_s6 + $0x90] sm:$0xff]  ;;  %v862_v37 = vld [vmem:[%s4737_s6 + $0x120] sm:$0xff] }
 0x30a   :  { %v864_v38 = vld [vmem:[%s4737_s6 + $0x130] sm:$0xff] }
 0x30b   :  { %v403_v4 = vmul.f32 1.442695, %v402_v3  ;;  %v847_v3 = vld [vmem:[%s4737_s6 + $0xa8] sm:$0xff]  ;;  %v3040_v41 = vpack.c.bf16 %v864_v38, %v862_v37  ;;  %v961_v37 = vld [vmem:[%s4738_s7] sm:$0xff] }
 0x30d   :  { %3315 = vpow2.f32 %v403_v4  ;;  %v849_v4 = vld [vmem:[%s4737_s6 + $0xb8] sm:$0xff] }
 0x30f   :  { %v3310_v51 = vpop.eup %3309 }
 0x310   :  { %v3312_v52 = vpop.eup %3311  ;;  %v625_v59 = vmul.f32 %v3310_v51, %v3753_v13  ;;  %v3012_v51 = vpack.c.bf16 %v836_v48, %v834_v47  ;;  %v3044_v47 = vpack.c.bf16 %v868_v44, %v866_v43  ;;  %v963_v44 = vld [vmem:[%s4738_s7 + $0x10] sm:$0xff] }
 0x311   :  { %v511_v53 = vmul.f32 %v3312_v52, %v3753_v13  ;;  %v3014_v52 = vpack.c.bf16 %v841_v50, %v839_v49  ;;  %v870_v49 = vld [vmem:[%s4737_s6 + $0x160] sm:$0xff]  ;;  %v872_v50 = vld [vmem:[%s4737_s6 + $0x170] sm:$0xff] }
 0x312   :  { %v626_v61 = vsel %vm398_vm6, %v625_v59, 0.0 }
 0x313   :  { %v512_v54 = vsel %vm398_vm6, %v511_v53, 0.0  ;;  %v3314_v60 = vpop.eup %3313 }
 0x314   :  { %513 = vadd.xlane.f32.xlu0 %v512_v54  ;;  %v730_v62 = vmul.f32 %v3314_v60, %v3753_v13  ;;  %v840_v54 = vld [vmem:[%s4737_s6 + $0x70] sm:$0xff]  ;;  %v845_v60 = vld [vmem:[%s4737_s6 + $0x98] sm:$0xff] }
 0x316   :  { %v731_v63 = vsel %vm398_vm6, %v730_v62, 0.0 }
 0x317   :  { %v3316_v6 = vpop.eup %3315 }
 0x318   :  { %627 = vadd.xlane.f32.xlu0 %v626_v61  ;;  %v405_v8 = vmul.f32 %v3316_v6, %v3753_v13 }
 0x31a   :  { %v406_v14 = vsel %vm398_vm6, %v405_v8, 0.0 }
 0x31c   :  { %732 = vadd.xlane.f32.xlu0 %v731_v63  ;;  %v842_v63 = vld [vmem:[%s4737_s6 + $0x80] sm:$0xff] }
 0x31d   :  { %v3020_v6 = vpack.c.bf16 %v844_v0, %v842_v63  ;;  %v881_v63 = vld [vmem:[%s4737_s6 + $0x1b8] sm:$0xff] }
 0x332   :  { %524 = vrot.lane.b32.xlu0 %v3722_v55, %s3396_s17 }
 0x351   :  { %407 = vadd.xlane.f32.xlu0 %v406_v14  ;;  %v846_v14 = vld [vmem:[%s4737_s6 + $0xa0] sm:$0xff] }
 0x3a1   :  { %v514_v15 = vpop.xlane.xlu0 %513 }
 0x3a2   :  { %v515_v16 = vmax.f32 %v514_v15, 1e-20  ;;  %v848_v15 = vld [vmem:[%s4737_s6 + $0xb0] sm:$0xff] }
 0x3a4   :  { %3317 = vrcp.f32 %v515_v16  ;;  %v851_v16 = vld [vmem:[%s4737_s6 + $0xc8] sm:$0xff] }
 0x3a5   :  { %v628_v17 = vpop.xlane.xlu0 %627 }
 0x3a6   :  { %v629_v18 = vmax.f32 %v628_v17, 1e-20  ;;  %v853_v17 = vld [vmem:[%s4737_s6 + $0xd8] sm:$0xff] }
 0x3a8   :  { %3319 = vrcp.f32 %v629_v18  ;;  %v3024_v18 = vpack.c.bf16 %v848_v15, %v846_v14  ;;  %v883_v14 = vld [vmem:[%s4737_s6 + $0x1c8] sm:$0xff]  ;;  %v885_v15 = vld [vmem:[%s4737_s6 + $0x1d8] sm:$0xff] }
 0x3a9   :  { %v733_v19 = vpop.xlane.xlu0 %732 }
 0x3aa   :  { %v734_v20 = vmax.f32 %v733_v19, 1e-20  ;;  %v3026_v19 = vpack.c.bf16 %v853_v17, %v851_v16  ;;  %v3058_v17 = vpack.c.bf16 %v885_v15, %v883_v14  ;;  %v987_v14 = vld [vmem:[%s4738_s7 + $0xd0] sm:$0xff]  ;;  %v988_v15 = vld [vmem:[%s4738_s7 + $0xd8] sm:$0xff] }
 0x3ac   :  { %3321 = vrcp.f32 %v734_v20  ;;  %v850_v20 = vld [vmem:[%s4737_s6 + $0xc0] sm:$0xff] }
 0x3ad   :  { %v525_v55 = vpop.permute.xlu0 %524 }
 0x3ae   :  { %v3318_v21 = vpop.eup %3317  ;;  %2862 = vmatpush3.msra.mxu1 %v525_v55  ;;  %v852_v55 = vld [vmem:[%s4737_s6 + $0xd0] sm:$0xff] }
 0x3af   :  { %2866 = vmatprep.subr.mxu1 %v3390_v7  ;;  %v517_v22 = vmul.f32 %v3318_v21, %v511_v53  ;;  %v838_v53 = vld [vmem:[%s4737_s6 + $0x60] sm:$0xff]  ;;  %v855_v21 = vld [vmem:[%s4737_s6 + $0xe8] sm:$0xff] }
 0x3b0   :  { %v3016_v61 = vpack.c.bf16 %v840_v54, %v838_v53  ;;  %v3048_v53 = vpack.c.bf16 %v872_v50, %v870_v49 }
 0x3b1   :  { %2864 = vmatmul.mubr.msk.f32.vlgmr.msra.gmra.mrb[2].mxu1 %vm398_vm6, %v517_v22  ;;  %v857_v22 = vld [vmem:[%s4737_s6 + $0xf8] sm:$0xff] }
 0x3b2   :  { %v3320_v23 = vpop.eup %3319  ;;  %2867 = vmatpush3.msra.mxu1 %v3724_v56  ;;  %2868 = vmatprep.mubr.msk.f32.mxu1 %vm3397_vm8, %v3390_v7 }
 0x3b3   :  { %2871 = vmatprep.subr.mxu1 %v3390_v7  ;;  %v631_v24 = vmul.f32 %v3320_v23, %v625_v59  ;;  %v843_v59 = vld [vmem:[%s4737_s6 + $0x88] sm:$0xff]  ;;  %v3028_v23 = vpack.c.bf16 %v852_v55, %v850_v20  ;;  %v2662_v20 = vld [vmem:[%s4736_s5 + $0x2] ss:$0 sm:$0xff] }
 0x3b5   :  { %2869 = vmatmul.mubr.msk.f32.vlgmr.msra.gmra.mrb[4].mxu1 %vm398_vm6, %v631_v24  ;;  %v3030_v24 = vpack.c.bf16 %v857_v22, %v855_v21  ;;  %v887_v21 = vld [vmem:[%s4737_s6 + $0x1e8] sm:$0xff]  ;;  %v889_v22 = vld [vmem:[%s4737_s6 + $0x1f8] sm:$0xff] }
 0x3b6   :  { %v3322_v27 = vpop.eup %3321  ;;  %2872 = vmatpush3.msra.mxu1 %v744_v26  ;;  %2873 = vmatprep.mubr.msk.f32.mxu1 %vm3397_vm8, %v3390_v7  ;;  %v854_v26 = vld [vmem:[%s4737_s6 + $0xe0] sm:$0xff] }
 0x3b7   :  { %v736_v28 = vmul.f32 %v3322_v27, %v730_v62  ;;  %v3018_v62 = vpack.c.bf16 %v845_v60, %v843_v59  ;;  %v856_v27 = vld [vmem:[%s4737_s6 + $0xf0] sm:$0xff]  ;;  %v874_v59 = vld [vmem:[%s4737_s6 + $0x180] sm:$0xff] }
 0x3b8   :  { %v876_v60 = vld [vmem:[%s4737_s6 + $0x190] sm:$0xff] }
 0x3b9   :  { %2874 = vmatmul.mubr.msk.f32.vlgmr.msra.gmra.mrb[6].mxu1 %vm398_vm6, %v736_v28  ;;  %v859_v28 = vld [vmem:[%s4737_s6 + $0x108] sm:$0xff] }
 0x3de   :  { %v408_v29 = vpop.xlane.xlu0 %407 }
 0x3df   :  { %v409_v30 = vmax.f32 %v408_v29, 1e-20  ;;  %v861_v29 = vld [vmem:[%s4737_s6 + $0x118] sm:$0xff] }
 0x3e1   :  { %3323 = vrcp.f32 %v409_v30  ;;  %v3032_v30 = vpack.c.bf16 %v856_v27, %v854_v26 }
 0x3eb   :  { %v3324_v56 = vpop.eup %3323 }
 0x3ec   :  { %v411_v31 = vmul.f32 %v3324_v56, %v405_v8  ;;  %v3022_v8 = vpack.c.bf16 %v849_v4, %v847_v3  ;;  %v3034_v56 = vpack.c.bf16 %v861_v29, %v859_v28  ;;  %v878_v3 = vld [vmem:[%s4737_s6 + $0x1a0] sm:$0xff]  ;;  %v880_v4 = vld [vmem:[%s4737_s6 + $0x1b0] sm:$0xff] }
 0x3ed   :  { %v886_v28 = vld [vmem:[%s4737_s6 + $0x1e0] sm:$0xff]  ;;  %v888_v29 = vld [vmem:[%s4737_s6 + $0x1f0] sm:$0xff] }
 0x3ee   :  { %2859 = vmatmul.mubr.msk.f32.vlgmr.msra.gmra.mrb[4].mxu0 %vm398_vm6, %v411_v31  ;;  %v858_v31 = vld [vmem:[%s4737_s6 + $0x100] sm:$0xff] }
 0x3ef   :  { %3005 = vmatpush1.bf16.msra.mxu0 %v3004_v39  ;;  %v3036_v35 = vpack.c.bf16 %v860_v32, %v858_v31  ;;  %v867_v39 = vld [vmem:[%s4737_s6 + $0x148] sm:$0xff]  ;;  %v2660_v32 = vld [vmem:[%s4736_s5 + $0x1] ss:$0 sm:$0xff] }
 0x3f0   :  { %3007 = vmatprep.subr.bf16.mxu0 %v3006_v40  ;;  %v869_v40 = vld [vmem:[%s4737_s6 + $0x158] sm:$0xff] }
 0x3f1   :  { %v3042_v42 = vpack.c.bf16 %v869_v40, %v867_v39  ;;  %v962_v39 = vld [vmem:[%s4738_s7 + $0x8] sm:$0xff]  ;;  %v979_v40 = vld [vmem:[%s4738_s7 + $0x90] sm:$0xff] }
 0x3f3   :  { %3009 = vmatpush1.bf16.msra.mxu0 %v3008_v45  ;;  %v871_v45 = vld [vmem:[%s4737_s6 + $0x168] sm:$0xff] }
 0x3f4   :  { %3011 = vmatprep.subr.bf16.mxu0 %v3010_v46  ;;  %v873_v46 = vld [vmem:[%s4737_s6 + $0x178] sm:$0xff] }
 0x3f5   :  { %v3046_v48 = vpack.c.bf16 %v873_v46, %v871_v45  ;;  %v964_v45 = vld [vmem:[%s4738_s7 + $0x18] sm:$0xff]  ;;  %v981_v46 = vld [vmem:[%s4738_s7 + $0xa0] sm:$0xff] }
 0x3f6   :  { %v3072_v49 = vpack.c.bf16 %v964_v45, %v963_v44  ;;  %v1064_v44 = vld [vmem:[%s4739_s8 + $0x8] sm:$0xff]  ;;  %v1081_v45 = vld [vmem:[%s4739_s8 + $0x90] sm:$0xff] }
 0x3f7   :  { %3013 = vmatpush1.bf16.msra.mxu0 %v3012_v51  ;;  %v875_v51 = vld [vmem:[%s4737_s6 + $0x188] sm:$0xff] }
 0x3f8   :  { %3015 = vmatprep.subr.bf16.mxu0 %v3014_v52  ;;  %v877_v52 = vld [vmem:[%s4737_s6 + $0x198] sm:$0xff] }
 0x3f9   :  { %v3050_v54 = vpack.c.bf16 %v877_v52, %v875_v51  ;;  %v965_v51 = vld [vmem:[%s4738_s7 + $0x20] sm:$0xff]  ;;  %v966_v52 = vld [vmem:[%s4738_s7 + $0x28] sm:$0xff] }
 0x3fb   :  { %3017 = vmatpush1.bf16.msra.mxu0 %v3016_v61  ;;  %v3052_v61 = vpack.c.bf16 %v876_v60, %v874_v59  ;;  %v3076_v59 = vpack.c.bf16 %v966_v52, %v965_v51  ;;  %v1065_v51 = vld [vmem:[%s4739_s8 + $0x10] sm:$0xff]  ;;  %v1066_v52 = vld [vmem:[%s4739_s8 + $0x18] sm:$0xff] }
 0x3fc   :  { %3019 = vmatprep.subr.bf16.mxu0 %v3018_v62  ;;  %v879_v62 = vld [vmem:[%s4737_s6 + $0x1a8] sm:$0xff] }
 0x3fd   :  { %v3054_v0 = vpack.c.bf16 %v881_v63, %v879_v62  ;;  %v968_v62 = vld [vmem:[%s4738_s7 + $0x38] sm:$0xff]  ;;  %v985_v63 = vld [vmem:[%s4738_s7 + $0xc0] sm:$0xff] }
 0x3ff   :  { %3021 = vmatpush1.bf16.msra.mxu0 %v3020_v6  ;;  %v3056_v6 = vpack.c.bf16 %v880_v4, %v878_v3 }
 0x400   :  { %3023 = vmatprep.subr.bf16.mxu0 %v3022_v8 }
 0x403   :  { %3025 = vmatpush1.bf16.msra.mxu0 %v3024_v18  ;;  %v882_v18 = vld [vmem:[%s4737_s6 + $0x1c0] sm:$0xff] }
 0x404   :  { %3027 = vmatprep.subr.bf16.mxu0 %v3026_v19  ;;  %v884_v19 = vld [vmem:[%s4737_s6 + $0x1d0] sm:$0xff] }
 0x405   :  { %v3060_v55 = vpack.c.bf16 %v884_v19, %v882_v18  ;;  %v971_v18 = vld [vmem:[%s4738_s7 + $0x50] sm:$0xff]  ;;  %v972_v19 = vld [vmem:[%s4738_s7 + $0x58] sm:$0xff] }
 0x407   :  { %3029 = vmatpush1.bf16.msra.mxu0 %v3028_v23  ;;  %v3062_v23 = vpack.c.bf16 %v889_v22, %v887_v21  ;;  %v3088_v21 = vpack.c.bf16 %v972_v19, %v971_v18  ;;  %v1071_v18 = vld [vmem:[%s4739_s8 + $0x40] sm:$0xff]  ;;  %v1072_v19 = vld [vmem:[%s4739_s8 + $0x48] sm:$0xff] }
 0x408   :  { %3031 = vmatprep.subr.bf16.mxu0 %v3030_v24 }
 0x40b   :  { %3033 = vmatpush1.bf16.msra.mxu0 %v3032_v30  ;;  %v2664_v30 = vld [vmem:[%s4736_s5 + $0x3] ss:$0 sm:$0xff] }
 0x40c   :  { %3035 = vmatprep.subr.bf16.mxu0 %v3034_v56  ;;  %v3064_v56 = vpack.c.bf16 %v888_v29, %v886_v28 }
 0x40f   :  { %3037 = vmatpush1.bf16.msra.mxu0 %v3036_v35  ;;  %v977_v35 = vld [vmem:[%s4738_s7 + $0x80] sm:$0xff] }
 0x410   :  { %3039 = vmatprep.subr.bf16.mxu0 %v3038_v36  ;;  %v978_v36 = vld [vmem:[%s4738_s7 + $0x88] sm:$0xff] }
 0x411   :  { %v3066_v38 = vpack.c.bf16 %v978_v36, %v977_v35 }
 0x413   :  { %3041 = vmatpush1.bf16.msra.mxu0 %v3040_v41  ;;  %v980_v41 = vld [vmem:[%s4738_s7 + $0x98] sm:$0xff]  ;;  %3067 = vmatprep.subr.bf16.mxu1 %v3066_v38 }
 0x414   :  { %3043 = vmatprep.subr.bf16.mxu0 %v3042_v42  ;;  %v3068_v42 = vpack.c.bf16 %v962_v39, %v961_v37  ;;  %v3070_v43 = vpack.c.bf16 %v980_v41, %v979_v40  ;;  %v1079_v40 = vld [vmem:[%s4739_s8 + $0x80] sm:$0xff]  ;;  %v1080_v41 = vld [vmem:[%s4739_s8 + $0x88] sm:$0xff] }
 0x416   :  { %3069 = vmatpush3.bf16.msra.mxu1 %v3068_v42  ;;  %v3098_v42 = vpack.c.bf16 %v1080_v41, %v1079_v40 }
 0x417   :  { %3045 = vmatpush1.bf16.msra.mxu0 %v3044_v47  ;;  %3071 = vmatprep.subr.bf16.mxu1 %v3070_v43  ;;  %v1063_v43 = vld [vmem:[%s4739_s8] sm:$0xff] }
 0x418   :  { %3047 = vmatprep.subr.bf16.mxu0 %v3046_v48  ;;  %v982_v48 = vld [vmem:[%s4738_s7 + $0xa8] sm:$0xff] }
 0x419   :  { %v3074_v50 = vpack.c.bf16 %v982_v48, %v981_v46  ;;  %v1082_v46 = vld [vmem:[%s4739_s8 + $0x98] sm:$0xff]  ;;  %v3100_v48 = vpack.c.bf16 %v1064_v44, %v1063_v43 }
 0x41a   :  { %3073 = vmatpush3.bf16.msra.mxu1 %v3072_v49 }
 0x41b   :  { %3049 = vmatpush1.bf16.msra.mxu0 %v3048_v53  ;;  %v983_v53 = vld [vmem:[%s4738_s7 + $0xb0] sm:$0xff]  ;;  %3075 = vmatprep.subr.bf16.mxu1 %v3074_v50  ;;  %v3102_v50 = vpack.c.bf16 %v1082_v46, %v1081_v45 }
 0x41c   :  { %3051 = vmatprep.subr.bf16.mxu0 %v3050_v54  ;;  %v984_v54 = vld [vmem:[%s4738_s7 + $0xb8] sm:$0xff] }
 0x41d   :  { %v3078_v60 = vpack.c.bf16 %v984_v54, %v983_v53  ;;  %v1083_v53 = vld [vmem:[%s4739_s8 + $0xa0] sm:$0xff]  ;;  %v1084_v54 = vld [vmem:[%s4739_s8 + $0xa8] sm:$0xff] }
 0x41e   :  { %3077 = vmatpush3.bf16.msra.mxu1 %v3076_v59  ;;  %v3104_v59 = vpack.c.bf16 %v1066_v52, %v1065_v51 }
 0x41f   :  { %3053 = vmatpush1.bf16.msra.mxu0 %v3052_v61  ;;  %v967_v61 = vld [vmem:[%s4738_s7 + $0x30] sm:$0xff]  ;;  %3079 = vmatprep.subr.bf16.mxu1 %v3078_v60  ;;  %v3106_v60 = vpack.c.bf16 %v1084_v54, %v1083_v53 }
 0x420   :  { %3055 = vmatprep.subr.bf16.mxu0 %v3054_v0  ;;  %v986_v0 = vld [vmem:[%s4738_s7 + $0xc8] sm:$0xff]  ;;  %v3080_v3 = vpack.c.bf16 %v968_v62, %v967_v61  ;;  %v1067_v61 = vld [vmem:[%s4739_s8 + $0x20] sm:$0xff] }
 0x421   :  { %v3082_v4 = vpack.c.bf16 %v986_v0, %v985_v63  ;;  %v1068_v62 = vld [vmem:[%s4739_s8 + $0x28] sm:$0xff]  ;;  %v1085_v63 = vld [vmem:[%s4739_s8 + $0xb0] sm:$0xff]  ;;  %v1086_v0 = vld [vmem:[%s4739_s8 + $0xb8] sm:$0xff] }
 0x422   :  { %3081 = vmatpush3.bf16.msra.mxu1 %v3080_v3  ;;  %v3108_v3 = vpack.c.bf16 %v1068_v62, %v1067_v61 }
 0x423   :  { %3057 = vmatpush1.bf16.msra.mxu0 %v3056_v6  ;;  %v969_v6 = vld [vmem:[%s4738_s7 + $0x40] sm:$0xff]  ;;  %3083 = vmatprep.subr.bf16.mxu1 %v3082_v4  ;;  %v3110_v4 = vpack.c.bf16 %v1086_v0, %v1085_v63 }
 0x424   :  { %3059 = vmatprep.subr.bf16.mxu0 %v3058_v17  ;;  %v3086_v17 = vpack.c.bf16 %v988_v15, %v987_v14  ;;  %v1087_v14 = vld [vmem:[%s4739_s8 + $0xc0] sm:$0xff]  ;;  %v1088_v15 = vld [vmem:[%s4739_s8 + $0xc8] sm:$0xff] }
 0x427   :  { %3061 = vmatpush1.bf16.msra.mxu0 %v3060_v55  ;;  %v990_v55 = vld [vmem:[%s4738_s7 + $0xe8] sm:$0xff] }
 0x428   :  { %3063 = vmatprep.subr.bf16.mxu0 %v3062_v23  ;;  %v973_v23 = vld [vmem:[%s4738_s7 + $0x60] sm:$0xff] }
 0x42b   :  { %3065 = vmatpush1.bf16.msra.mxu0 %v3064_v56  ;;  %v976_v56 = vld [vmem:[%s4738_s7 + $0x78] sm:$0xff] }
 0x42c   :  { %2876 = vmatprep.subr.mxu0 %v3390_v7 }
 0x484   :  { %v596_v8 = vpop.f32.mrb[2].mxu1 }
 0x485   :  { %v2865_v16 = vpop.f32.mrb[3].mxu1  ;;  %v597_v47 = vadd.f32 %v2660_v32, %v596_v8  ;;  %v970_v8 = vld [vmem:[%s4738_s7 + $0x48] sm:$0xff]  ;;  %v2658_v32 = vld [vmem:[%s4736_s5] ss:$0 sm:$0xff] }
 0x486   :  { %v3084_v16 = vpack.c.bf16 %v970_v8, %v969_v6  ;;  %v1069_v6 = vld [vmem:[%s4739_s8 + $0x30] sm:$0xff]  ;;  %v1070_v8 = vld [vmem:[%s4739_s8 + $0x38] sm:$0xff] }
 0x488   :  { %v706_v24 = vpop.f32.mrb[4].mxu1  ;;  %3085 = vmatpush3.bf16.msra.mxu1 %v3084_v16  ;;  %v3112_v16 = vpack.c.bf16 %v1070_v8, %v1069_v6 }
 0x489   :  { %v707_v26 = vadd.f32 %v2662_v20, %v706_v24  ;;  %v2870_v27 = vpop.f32.mrb[5].mxu1  ;;  %v989_v20 = vld [vmem:[%s4738_s7 + $0xe0] sm:$0xff]  ;;  %3087 = vmatprep.subr.bf16.mxu1 %v3086_v17  ;;  %v974_v24 = vld [vmem:[%s4738_s7 + $0x68] sm:$0xff]  ;;  %v3114_v17 = vpack.c.bf16 %v1088_v15, %v1087_v14 }
 0x48a   :  { %v3090_v22 = vpack.c.bf16 %v990_v55, %v989_v20  ;;  %v992_v27 = vld [vmem:[%s4738_s7 + $0xf8] sm:$0xff]  ;;  %v3092_v28 = vpack.c.bf16 %v974_v24, %v973_v23  ;;  %v1089_v20 = vld [vmem:[%s4739_s8 + $0xd0] sm:$0xff] }
 0x48b   :  { %710 = vst.msk [vmem:[#allocation2 + $0x8] sm:$0xff] %vm490_vm9, %v707_v26  ;;  %v991_v26 = vld [vmem:[%s4738_s7 + $0xf0] sm:$0xff]  ;;  %v1090_v55 = vld [vmem:[%s4739_s8 + $0xd8] sm:$0xff] }
 0x48c   :  { %v815_v31 = vpop.f32.mrb[6].mxu1  ;;  %3089 = vmatpush3.bf16.msra.mxu1 %v3088_v21  ;;  %v3094_v29 = vpack.c.bf16 %v992_v27, %v991_v26  ;;  %v3116_v21 = vpack.c.bf16 %v1072_v19, %v1071_v18  ;;  %v1073_v23 = vld [vmem:[%s4739_s8 + $0x50] sm:$0xff]  ;;  %v1074_v24 = vld [vmem:[%s4739_s8 + $0x58] sm:$0xff]  ;;  %v1091_v26 = vld [vmem:[%s4739_s8 + $0xe0] sm:$0xff] }
 0x48d   :  { %v816_v33 = vadd.f32 %v2664_v30, %v815_v31  ;;  %v2875_v34 = vpop.f32.mrb[7].mxu1  ;;  %3091 = vmatprep.subr.bf16.mxu1 %v3090_v22  ;;  %v975_v30 = vld [vmem:[%s4738_s7 + $0x70] sm:$0xff]  ;;  %v3118_v22 = vpack.c.bf16 %v1090_v55, %v1089_v20  ;;  %v1092_v27 = vld [vmem:[%s4739_s8 + $0xe8] sm:$0xff]  ;;  %s3403_s7 = smov [#allocation4]  }
 0x48e   :  { %v3096_v31 = vpack.c.bf16 %v976_v56, %v975_v30  ;;  %v1075_v30 = vld [vmem:[%s4739_s8 + $0x60] sm:$0xff]  ;;  %v1076_v56 = vld [vmem:[%s4739_s8 + $0x68] sm:$0xff]  ;;  %s2647_s22 = sshll.u32 %s3403_s7, 4  ;;  %s2648_s22 = int_to_ptr.vmem [resolvable:$true] %s2647_s22 }
 0x48f   :  { %820 = vrot.lane.b32.xlu1 %v816_v33, %s3396_s17  ;;  %s3366_s23 = scalar_lea.vmem %s2648_s22, 128  ;;  %p3371_p1 = scmp.lt.s32.totalorder %s2648_s22, %s2648_s22 }
 0x490   :  { %3093 = vmatpush3.bf16.msra.mxu1 %v3092_v28  ;;  %v3120_v28 = vpack.c.bf16 %v1074_v24, %v1073_v23  ;;  %p3367_p0 = scmp.ne.s32.totalorder %s2648_s22, %s3366_s23  ;;  %p3372_p2 = scmp.lt.s32.totalorder %s3366_s23, %s3366_s23 }
 0x491   :  { %3095 = vmatprep.subr.bf16.mxu1 %v3094_v29  ;;  %v3122_v29 = vpack.c.bf16 %v1092_v27, %v1091_v26 }
 0x492   :  { %p3373_p3 = por %p3372_p2, %p3371_p1 }
 0x493   :  { %601 = vrot.lane.b32.xlu1 %v597_v47, %s3396_s17 }
 0x494   :  { %3097 = vmatpush3.bf16.msra.mxu1 %v3096_v31  ;;  %v1093_v31 = vld [vmem:[%s4739_s8 + $0xf0] sm:$0xff]  ;;  %p3374_p4 = pnand %p3373_p3, %p3367_p0 }
 0x495   :  { %3099 = vmatprep.subr.bf16.mxu1 %v3098_v42 }
 0x4c1   :  { %v486_v33 = vpop.f32.mrb[4].mxu0 }
 0x4c2   :  { %v487_v34 = vadd.f32 %v2658_v32, %v486_v33  ;;  %v2860_v35 = vpop.f32.mrb[5].mxu0  ;;  %v1094_v32 = vld [vmem:[%s4739_s8 + $0xf8] sm:$0xff]  ;;  %v3124_v33 = vpack.c.bf16 %v1076_v56, %v1075_v30 }
 0x4c3   :  { %v1077_v35 = vld [vmem:[%s4739_s8 + $0x70] sm:$0xff] }
 0x4c4   :  { %491 = vst.msk [vmem:[#allocation2] sm:$0xff] %vm490_vm9, %v487_v34  ;;  %v3126_v34 = vpack.c.bf16 %v1094_v32, %v1093_v31 }
 0x501   :  { %v821_v36 = vpop.permute.xlu1 %820 }
 0x502   :  { %823 = vst.msk [vmem:[#allocation2 + $0x8] sm:$0xff] %vm604_vm10, %v821_v36  ;;  %v1078_v36 = vld [vmem:[%s4739_s8 + $0x78] sm:$0xff] }
 0x505   :  { %v602_v37 = vpop.permute.xlu1 %601 }
 0x506   :  { %605 = vst.msk [vmem:[#allocation2] sm:$0xff] %vm604_vm10, %v602_v37  ;;  %v3128_v37 = vpack.c.bf16 %v1078_v36, %v1077_v35 }
 0x509   :  { %v825_v38 = vld [vmem:[#allocation2 + $0x8] sm:$0xff] }
 0x50a   :  { %954 = vmatprep.mubr.f32.mxu0 %v825_v38 }
 0x50d   :  { %v824_v39 = vld [vmem:[#allocation2] sm:$0xff] }
 0x50e   :  { %955 = vmatmul.mubr.f32.vlgmr.msra.gmra.mrb[6].mxu0 %v824_v39 }
 0x50f   :  { %2878 = vmatprep.mubr.msk.f32.mxu0 %vm3397_vm8, %v3390_v7 }
 0x5e1   :  { %v4124_v47 = vpop.f32.mrb[6].mxu0 }
 0x5e2   :  { %v4126_v49 = vpop.f32.mrb[7].mxu0  ;;  %2877 = vmatpush3.msra.mxu0 %v4124_v47 }
 0x5e3   :  { %1057 = vmatprep.mubr.f32.mxu1 %v4126_v49  ;;  %2886 = vmatprep.subr.mxu0 %v3390_v7 }
 0x5e4   :  { %1058 = vmatmul.mubr.f32.vlgmr.msra.gmra.mrb[8].mxu1 %v4124_v47 }
 0x5e5   :  { %3101 = vmatpush3.bf16.msra.mxu1 %v3100_v48  ;;  %1159 = vmatprep.mubr.f32.mxu1 %v4126_v49 }
 0x5e6   :  { %3103 = vmatprep.subr.bf16.mxu1 %v3102_v50 }
 0x5e9   :  { %3105 = vmatpush3.bf16.msra.mxu1 %v3104_v59 }
 0x5ea   :  { %3107 = vmatprep.subr.bf16.mxu1 %v3106_v60 }
 0x5ed   :  { %3109 = vmatpush3.bf16.msra.mxu1 %v3108_v3 }
 0x5ee   :  { %3111 = vmatprep.subr.bf16.mxu1 %v3110_v4 }
 0x5f1   :  { %3113 = vmatpush3.bf16.msra.mxu1 %v3112_v16 }
 0x5f2   :  { %3115 = vmatprep.subr.bf16.mxu1 %v3114_v17 }
 0x5f5   :  { %3117 = vmatpush3.bf16.msra.mxu1 %v3116_v21 }
 0x5f6   :  { %3119 = vmatprep.subr.bf16.mxu1 %v3118_v22 }
 0x5f9   :  { %3121 = vmatpush3.bf16.msra.mxu1 %v3120_v28 }
 0x5fa   :  { %3123 = vmatprep.subr.bf16.mxu1 %v3122_v29 }
 0x5fd   :  { %3125 = vmatpush3.bf16.msra.mxu1 %v3124_v33 }
 0x5fe   :  { %3127 = vmatprep.subr.bf16.mxu1 %v3126_v34 }
 0x601   :  { %3129 = vmatpush3.bf16.msra.mxu1 %v3128_v37 }
 0x602   :  { %2881 = vmatprep.subr.mxu1 %v3390_v7 }
 0x604   :  { %1160 = vmatmul.mubr.f32.vlgmr.msra.gmra.mrb[10].mxu1 %v4124_v47 }
 0x605   :  { %2883 = vmatprep.mubr.msk.f32.mxu1 %vm3397_vm8, %v3390_v7 }
 0x6b7   :  { %v2798_v38 = vpop.f32.mrb[8].mxu1 }
 0x6b8   :  { %v2799_v39 = vpop.f32.mrb[9].mxu1 }
 0x6b9   :  { %v2800_v40 = vadd.f32 %v2799_v39, %v2798_v38 }
 0x6d7   :  { %v2833_v41 = vpop.f32.mrb[10].mxu1 }
 0x6d8   :  { %v2834_v42 = vpop.f32.mrb[11].mxu1 }
 0x6d9   :  { %v2835_v43 = vadd.f32 %v2834_v42, %v2833_v41 }
 0x6db   :  { %1199 = vperm.xlu0 %3299, %v2835_v43   ;;  %1304 = vperm.xlu1 %3300, %v2835_v43  }
 0x6df   :  { %3302 = vset.pattern.permute.xlu0 %v3393_v1  ;;  %3301 = vset.pattern.permute.xlu1 %v3391_v57 }
 0x6e0   :  { %1417 = vperm.xlu0 %3302, %v2835_v43   ;;  %1522 = vperm.xlu1 %3301, %v2835_v43  }
 0x6e4   :  { %3306 = vset.pattern.permute.xlu0 %v3391_v57 }
 0x709   :  { %1165 = vxpose.xlu1.b32.start.end [1/1] (short) (narrow) %v2800_v40, 8 }
 0x727   :  { %3303 = vset.pattern.permute.xlu1 %v3394_v2 }
 0x75a   :  { %v1305_v44 = vpop.permute.xlu1 %1304  ;;  %v1200_v45 = vpop.permute.xlu0 %1199 }
 0x75f   :  { %v1523_v46 = vpop.permute.xlu1 %1522  ;;  %v1418_v54 = vpop.permute.xlu0 %1417 }
 0x789   :  { %v1181_v48 = vpop.trf.xlu1 }
 0x78a   :  { %v1205_v50 = vrot.slane %v1181_v48, %v3739_v9  ;;  %v1310_v51 = vrot.slane %v1181_v48, %v3742_v10  ;;  %v1423_v52 = vrot.slane %v1181_v48, %v3745_v11  ;;  %v1528_v53 = vrot.slane %v1181_v48, %v3748_v12 }
 0x78c   :  { %v1206_v59 = vadd.f32 %v1205_v50, %v1200_v45  ;;  %v1311_v60 = vadd.f32 %v1310_v51, %v1305_v44  ;;  %v1424_v61 = vadd.f32 %v1423_v52, %v1418_v54  ;;  %v1529_v57 = vadd.f32 %v1528_v53, %v1523_v46 }
 0x78e   :  { %vm1530_vm11 = vcmp.ge.f32.partialorder %v1529_v57, 0.0  ;;  %v1531_v62 = vmul.f32 0.2, %v1529_v57  ;;  %vm1312_vm12 = vcmp.ge.f32.partialorder %v1311_v60, 0.0  ;;  %v1313_v2 = vmul.f32 0.2, %v1311_v60 }
 0x78f   :  { %vm1207_vm13 = vcmp.ge.f32.partialorder %v1206_v59, 0.0  ;;  %v1208_v63 = vmul.f32 0.2, %v1206_v59  ;;  %v1426_v4 = vmul.f32 0.2, %v1424_v61  ;;  %vm1425_vm14 = vcmp.ge.f32.partialorder %v1424_v61, 0.0 }
 0x790   :  { %v1532_v0 = vsel %vm1530_vm11, %v1529_v57, %v1531_v62  ;;  %v1314_v3 = vsel %vm1312_vm12, %v1311_v60, %v1313_v2 }
 0x791   :  { %v1533_v6 = vadd.f32 %v1532_v0, %v3760_v25  ;;  %v1315_v8 = vadd.f32 %v1314_v3, %v3760_v25  ;;  %v1209_v14 = vsel %vm1207_vm13, %v1206_v59, %v1208_v63  ;;  %v1427_v18 = vsel %vm1425_vm14, %v1424_v61, %v1426_v4  ;;  %v1637_v3 = vld [vmem:[%s4741_s10 + $0x8] sm:$0xff]  ;;  %v1636_v4 = vld [vmem:[%s4741_s10] sm:$0xff] }
 0x792   :  { %v1210_v17 = vadd.f32 %v1209_v14, %v3760_v25  ;;  %v1428_v20 = vadd.f32 %v1427_v18, %v3760_v25  ;;  %v1641_v14 = vld [vmem:[%s4741_s10 + $0x28] sm:$0xff]  ;;  %v1640_v18 = vld [vmem:[%s4741_s10 + $0x20] sm:$0xff] }
 0x793   :  { %v1534_v15 = vsel %vm398_vm6, %v1533_v6, -inf  ;;  %v1316_v16 = vsel %vm398_vm6, %v1315_v8, -inf }
 0x794   :  { %1535 = vmax.xlane.f32.xlu1 %v1534_v15  ;;  %1317 = vmax.xlane.f32.xlu0 %v1316_v16  ;;  %v1211_v19 = vsel %vm398_vm6, %v1210_v17, -inf  ;;  %v1429_v55 = vsel %vm398_vm6, %v1428_v20, -inf  ;;  %v1643_v15 = vld [vmem:[%s4741_s10 + $0x38] sm:$0xff] }
 0x798   :  { %1212 = vmax.xlane.f32.xlu0 %v1211_v19  ;;  %v1642_v19 = vld [vmem:[%s4741_s10 + $0x30] sm:$0xff] }
 0x79c   :  { %1430 = vmax.xlane.f32.xlu0 %v1429_v55  ;;  %v1647_v55 = vld [vmem:[%s4741_s10 + $0x58] sm:$0xff] }
 0x7a5   :  { %1335 = vrot.lane.b32.xlu1 %v4124_v47, %s3396_s17 }
 0x821   :  { %v1536_v21 = vpop.xlane.xlu1 %1535  ;;  %v1318_v22 = vpop.xlane.xlu0 %1317 }
 0x822   :  { %v1537_v23 = vsub.f32 %v1533_v6, %v1536_v21  ;;  %v1319_v24 = vsub.f32 %v1315_v8, %v1318_v22  ;;  %v1638_v8 = vld [vmem:[%s4741_s10 + $0x10] sm:$0xff]  ;;  %v3136_v21 = vpack.c.bf16 %v1642_v19, %v1640_v18  ;;  %v1681_v19 = vld [vmem:[%s4741_s10 + $0x168] sm:$0xff] }
 0x823   :  { %v3132_v16 = vpack.c.bf16 %v1638_v8, %v1636_v4  ;;  %v1672_v4 = vld [vmem:[%s4741_s10 + $0x120] sm:$0xff]  ;;  %v1677_v8 = vld [vmem:[%s4741_s10 + $0x148] sm:$0xff]  ;;  %v1678_v18 = vld [vmem:[%s4741_s10 + $0x150] sm:$0xff] }
 0x824   :  { %v1538_v26 = vmul.f32 1.442695, %v1537_v23  ;;  %v1320_v27 = vmul.f32 1.442695, %v1319_v24  ;;  %v1644_v23 = vld [vmem:[%s4741_s10 + $0x40] sm:$0xff]  ;;  %v1646_v24 = vld [vmem:[%s4741_s10 + $0x50] sm:$0xff] }
 0x825   :  { %v1336_v28 = vpop.permute.xlu1 %1335  ;;  %v1213_v29 = vpop.xlane.xlu0 %1212 }
 0x826   :  { %3325 = vpow2.f32 %v1538_v26  ;;  %v1214_v30 = vsub.f32 %v1210_v17, %v1213_v29  ;;  %2882 = vmatpush3.msra.mxu1 %v1336_v28  ;;  %v3134_v17 = vpack.c.bf16 %v1643_v15, %v1641_v14  ;;  %v1649_v26 = vld [vmem:[%s4741_s10 + $0x68] sm:$0xff]  ;;  %v3140_v28 = vpack.c.bf16 %v1646_v24, %v1644_v23  ;;  %v1679_v14 = vld [vmem:[%s4741_s10 + $0x158] sm:$0xff]  ;;  %v1682_v23 = vld [vmem:[%s4741_s10 + $0x170] sm:$0xff] }
 0x827   :  { %3327 = vpow2.f32 %v1320_v27  ;;  %2891 = vmatprep.subr.mxu1 %v3390_v7  ;;  %v1651_v27 = vld [vmem:[%s4741_s10 + $0x78] sm:$0xff]  ;;  %v1685_v24 = vld [vmem:[%s4741_s10 + $0x188] sm:$0xff] }
 0x828   :  { %v1215_v56 = vmul.f32 1.442695, %v1214_v30  ;;  %v3142_v29 = vpack.c.bf16 %v1651_v27, %v1649_v26  ;;  %v1648_v30 = vld [vmem:[%s4741_s10 + $0x60] sm:$0xff]  ;;  %v1687_v26 = vld [vmem:[%s4741_s10 + $0x198] sm:$0xff] }
 0x829   :  { %v1431_v39 = vpop.xlane.xlu0 %1430 }
 0x82a   :  { %3329 = vpow2.f32 %v1215_v56  ;;  %v1432_v40 = vsub.f32 %v1428_v20, %v1431_v39  ;;  %v1645_v20 = vld [vmem:[%s4741_s10 + $0x48] sm:$0xff]  ;;  %v1650_v56 = vld [vmem:[%s4741_s10 + $0x70] sm:$0xff] }
 0x82b   :  { %v3138_v22 = vpack.c.bf16 %v1647_v55, %v1645_v20  ;;  %v1683_v20 = vld [vmem:[%s4741_s10 + $0x178] sm:$0xff] }
 0x82c   :  { %v1433_v41 = vmul.f32 1.442695, %v1432_v40  ;;  %v1656_v40 = vld [vmem:[%s4741_s10 + $0xa0] sm:$0xff] }
 0x82e   :  { %3331 = vpow2.f32 %v1433_v41  ;;  %v1658_v41 = vld [vmem:[%s4741_s10 + $0xb0] sm:$0xff] }
 0x830   :  { %v3326_v31 = vpop.eup %3325 }
 0x831   :  { %v3328_v32 = vpop.eup %3327  ;;  %v1540_v35 = vmul.f32 %v3326_v31, %v3753_v13  ;;  %v1653_v31 = vld [vmem:[%s4741_s10 + $0x88] sm:$0xff] }
 0x832   :  { %v1322_v47 = vmul.f32 %v3328_v32, %v3753_v13  ;;  %v1655_v32 = vld [vmem:[%s4741_s10 + $0x98] sm:$0xff] }
 0x833   :  { %v1541_v38 = vsel %vm398_vm6, %v1540_v35, 0.0 }
 0x834   :  { %v3330_v33 = vpop.eup %3329  ;;  %v1323_v34 = vsel %vm398_vm6, %v1322_v47, 0.0 }
 0x835   :  { %1324 = vadd.xlane.f32.xlu0 %v1323_v34  ;;  %v1217_v36 = vmul.f32 %v3330_v33, %v3753_v13  ;;  %v3146_v33 = vpack.c.bf16 %v1655_v32, %v1653_v31  ;;  %v1652_v34 = vld [vmem:[%s4741_s10 + $0x80] sm:$0xff]  ;;  %v1689_v31 = vld [vmem:[%s4741_s10 + $0x1a8] sm:$0xff]  ;;  %v1691_v32 = vld [vmem:[%s4741_s10 + $0x1b8] sm:$0xff] }
 0x837   :  { %v1218_v37 = vsel %vm398_vm6, %v1217_v36, 0.0 }
 0x838   :  { %1219 = vadd.xlane.f32.xlu1 %v1218_v37  ;;  %v3332_v42 = vpop.eup %3331  ;;  %v1659_v37 = vld [vmem:[%s4741_s10 + $0xb8] sm:$0xff] }
 0x839   :  { %1542 = vadd.xlane.f32.xlu0 %v1541_v38  ;;  %v1435_v43 = vmul.f32 %v3332_v42, %v3753_v13  ;;  %v1661_v42 = vld [vmem:[%s4741_s10 + $0xc8] sm:$0xff] }
 0x83b   :  { %v1436_v44 = vsel %vm398_vm6, %v1435_v43, 0.0 }
 0x84f   :  { %1553 = vrot.lane.b32.xlu0 %v4126_v49, %s3396_s17 }
 0x86e   :  { %1437 = vadd.xlane.f32.xlu0 %v1436_v44  ;;  %v3152_v44 = vpack.c.bf16 %v1658_v41, %v1656_v40  ;;  %v1694_v40 = vld [vmem:[%s4741_s10 + $0x1d0] sm:$0xff]  ;;  %v1697_v41 = vld [vmem:[%s4741_s10 + $0x1e8] sm:$0xff] }
 0x8c2   :  { %v1325_v45 = vpop.xlane.xlu0 %1324 }
 0x8c3   :  { %v1326_v46 = vmax.f32 %v1325_v45, 1e-20 }
 0x8c5   :  { %3333 = vrcp.f32 %v1326_v46  ;;  %v1220_v48 = vpop.xlane.xlu1 %1219  ;;  %v1660_v46 = vld [vmem:[%s4741_s10 + $0xc0] sm:$0xff] }
 0x8c6   :  { %v1221_v50 = vmax.f32 %v1220_v48, 1e-20  ;;  %v1543_v51 = vpop.xlane.xlu0 %1542  ;;  %v1662_v48 = vld [vmem:[%s4741_s10 + $0xd0] sm:$0xff] }
 0x8c7   :  { %v1544_v52 = vmax.f32 %v1543_v51, 1e-20  ;;  %v1667_v51 = vld [vmem:[%s4741_s10 + $0xf8] sm:$0xff] }
 0x8c8   :  { %3335 = vrcp.f32 %v1221_v50  ;;  %v1665_v50 = vld [vmem:[%s4741_s10 + $0xe8] sm:$0xff] }
 0x8c9   :  { %3337 = vrcp.f32 %v1544_v52  ;;  %v3156_v52 = vpack.c.bf16 %v1662_v48, %v1660_v46 }
 0x8ca   :  { %v1554_v60 = vpop.permute.xlu0 %1553 }
 0x8cf   :  { %v3334_v53 = vpop.eup %3333 }
 0x8d0   :  { %v1328_v54 = vmul.f32 %v3334_v53, %v1322_v47  ;;  %v3144_v47 = vpack.c.bf16 %v1650_v56, %v1648_v30  ;;  %v3158_v53 = vpack.c.bf16 %v1667_v51, %v1665_v50  ;;  %v1686_v30 = vld [vmem:[%s4741_s10 + $0x190] sm:$0xff]  ;;  %v2668_v50 = vld [vmem:[%s4740_s9 + $0x1] ss:$0 sm:$0xff] }
 0x8d2   :  { %v3336_v59 = vpop.eup %3335  ;;  %2884 = vmatmul.mubr.msk.f32.vlgmr.msra.gmra.mrb[12].mxu1 %vm398_vm6, %v1328_v54  ;;  %v1664_v54 = vld [vmem:[%s4741_s10 + $0xe0] sm:$0xff] }
 0x8d3   :  { %v3338_v61 = vpop.eup %3337  ;;  %2892 = vmatpush3.msra.mxu1 %v1554_v60  ;;  %2893 = vmatprep.mubr.msk.f32.mxu1 %vm3397_vm8, %v3390_v7  ;;  %v1223_v13 = vmul.f32 %v3336_v59, %v1217_v36  ;;  %v1657_v36 = vld [vmem:[%s4741_s10 + $0xa8] sm:$0xff]  ;;  %v1666_v59 = vld [vmem:[%s4741_s10 + $0xf0] sm:$0xff] }
 0x8d4   :  { %v1546_v57 = vmul.f32 %v3338_v61, %v1540_v35  ;;  %v1654_v35 = vld [vmem:[%s4741_s10 + $0x90] sm:$0xff]  ;;  %v3150_v39 = vpack.c.bf16 %v1659_v37, %v1657_v36  ;;  %v1669_v60 = vld [vmem:[%s4741_s10 + $0x108] sm:$0xff]  ;;  %v1671_v61 = vld [vmem:[%s4741_s10 + $0x118] sm:$0xff] }
 0x8d5   :  { %2879 = vmatmul.mubr.msk.f32.vlgmr.msra.gmra.mrb[8].mxu0 %vm398_vm6, %v1223_v13  ;;  %v3148_v38 = vpack.c.bf16 %v1654_v35, %v1652_v34  ;;  %v3160_v13 = vpack.c.bf16 %v1666_v59, %v1664_v54  ;;  %v1690_v34 = vld [vmem:[%s4741_s10 + $0x1b0] sm:$0xff]  ;;  %v1693_v36 = vld [vmem:[%s4741_s10 + $0x1c8] sm:$0xff]  ;;  %v1695_v37 = vld [vmem:[%s4741_s10 + $0x1d8] sm:$0xff] }
 0x8d6   :  { %2887 = vmatpush3.msra.mxu0 %v4126_v49  ;;  %2894 = vmatmul.mubr.msk.f32.vlgmr.msra.gmra.mrb[14].mxu1 %vm398_vm6, %v1546_v57  ;;  %v1639_v49 = vld [vmem:[%s4741_s10 + $0x18] sm:$0xff]  ;;  %v3162_v57 = vpack.c.bf16 %v1671_v61, %v1669_v60  ;;  %v2666_v54 = vld [vmem:[%s4740_s9] ss:$0 sm:$0xff]  ;;  %v2672_v59 = vld [vmem:[%s4740_s9 + $0x3] ss:$0 sm:$0xff] }
 0x8d7   :  { %2888 = vmatprep.mubr.msk.f32.mxu0 %vm3397_vm8, %v3390_v7  ;;  %v3130_v6 = vpack.c.bf16 %v1639_v49, %v1637_v3  ;;  %v1771_v61 = vld [vmem:[%s4742_s11] sm:$0xff] }
 0x8d9   :  { %3131 = vmatprep.subr.bf16.mxu0 %v3130_v6  ;;  %v1674_v6 = vld [vmem:[%s4741_s10 + $0x130] sm:$0xff] }
 0x8da   :  { %v3168_v15 = vpack.c.bf16 %v1674_v6, %v1672_v4 }
 0x8fb   :  { %v1438_v62 = vpop.xlane.xlu0 %1437 }
 0x8fc   :  { %v1439_v2 = vmax.f32 %v1438_v62, 1e-20  ;;  %v1668_v62 = vld [vmem:[%s4741_s10 + $0x100] sm:$0xff] }
 0x8fe   :  { %3339 = vrcp.f32 %v1439_v2  ;;  %v1670_v2 = vld [vmem:[%s4741_s10 + $0x110] sm:$0xff] }
 0x8ff   :  { %v3164_v3 = vpack.c.bf16 %v1670_v2, %v1668_v62 }
 0x908   :  { %v3340_v63 = vpop.eup %3339 }
 0x909   :  { %v1441_v0 = vmul.f32 %v3340_v63, %v1435_v43  ;;  %v1663_v43 = vld [vmem:[%s4741_s10 + $0xd8] sm:$0xff]  ;;  %v1673_v63 = vld [vmem:[%s4741_s10 + $0x128] sm:$0xff] }
 0x90a   :  { %v3154_v45 = vpack.c.bf16 %v1663_v43, %v1661_v42  ;;  %v1699_v43 = vld [vmem:[%s4741_s10 + $0x1f8] sm:$0xff] }
 0x90b   :  { %2889 = vmatmul.mubr.msk.f32.vlgmr.msra.gmra.mrb[10].mxu0 %vm398_vm6, %v1441_v0  ;;  %v1675_v0 = vld [vmem:[%s4741_s10 + $0x138] sm:$0xff]  ;;  %v3190_v46 = vpack.c.bf16 %v1699_v43, %v1697_v41 }
 0x90c   :  { %3133 = vmatpush1.bf16.msra.mxu0 %v3132_v16  ;;  %v3166_v49 = vpack.c.bf16 %v1675_v0, %v1673_v63  ;;  %v3170_v16 = vpack.c.bf16 %v1679_v14, %v1677_v8  ;;  %v3398_v0 = vmov 0.0|0.0   ;;  %v1775_v14 = vld [vmem:[%s4742_s11 + $0x20] sm:$0xff] }
 0x90d   :  { %3135 = vmatprep.subr.bf16.mxu0 %v3134_v17  ;;  %v1676_v17 = vld [vmem:[%s4741_s10 + $0x140] sm:$0xff]  ;;  %3194 = vmatprep.subr.bf16.mxu1 %v3398_v0 }
 0x90e   :  { %v3172_v55 = vpack.c.bf16 %v1678_v18, %v1676_v17  ;;  %v1777_v17 = vld [vmem:[%s4742_s11 + $0x30] sm:$0xff]  ;;  %v1778_v18 = vld [vmem:[%s4742_s11 + $0x38] sm:$0xff] }
 0x910   :  { %3137 = vmatpush1.bf16.msra.mxu0 %v3136_v21  ;;  %v3174_v21 = vpack.c.bf16 %v1683_v20, %v1681_v19  ;;  %v3204_v19 = vpack.c.bf16 %v1778_v18, %v1777_v17  ;;  %v1779_v20 = vld [vmem:[%s4742_s11 + $0x40] sm:$0xff] }
 0x911   :  { %3139 = vmatprep.subr.bf16.mxu0 %v3138_v22  ;;  %v1680_v22 = vld [vmem:[%s4741_s10 + $0x160] sm:$0xff] }
 0x912   :  { %v3176_v27 = vpack.c.bf16 %v1682_v23, %v1680_v22  ;;  %v1781_v22 = vld [vmem:[%s4742_s11 + $0x50] sm:$0xff]  ;;  %v1782_v23 = vld [vmem:[%s4742_s11 + $0x58] sm:$0xff]  ;;  %v1880_v18 = vld [vmem:[%s4743_s12 + $0x60] sm:$0xff] }
 0x914   :  { %3141 = vmatpush1.bf16.msra.mxu0 %v3140_v28  ;;  %v3178_v28 = vpack.c.bf16 %v1687_v26, %v1685_v24  ;;  %v3210_v24 = vpack.c.bf16 %v1782_v23, %v1781_v22  ;;  %v1783_v26 = vld [vmem:[%s4742_s11 + $0x60] sm:$0xff] }
 0x915   :  { %3143 = vmatprep.subr.bf16.mxu0 %v3142_v29  ;;  %v1684_v29 = vld [vmem:[%s4741_s10 + $0x180] sm:$0xff] }
 0x916   :  { %v3180_v56 = vpack.c.bf16 %v1686_v30, %v1684_v29  ;;  %v1785_v29 = vld [vmem:[%s4742_s11 + $0x70] sm:$0xff]  ;;  %v1786_v30 = vld [vmem:[%s4742_s11 + $0x78] sm:$0xff]  ;;  %v1884_v23 = vld [vmem:[%s4743_s12 + $0x80] sm:$0xff] }
 0x918   :  { %3145 = vmatpush1.bf16.msra.mxu0 %v3144_v47  ;;  %v3182_v47 = vpack.c.bf16 %v1691_v32, %v1689_v31  ;;  %v1787_v31 = vld [vmem:[%s4742_s11 + $0x80] sm:$0xff]  ;;  %v1788_v32 = vld [vmem:[%s4742_s11 + $0x88] sm:$0xff] }
 0x919   :  { %3147 = vmatprep.subr.bf16.mxu0 %v3146_v33  ;;  %v1688_v33 = vld [vmem:[%s4741_s10 + $0x1a0] sm:$0xff] }
 0x91a   :  { %v3184_v35 = vpack.c.bf16 %v1690_v34, %v1688_v33  ;;  %v1789_v33 = vld [vmem:[%s4742_s11 + $0x90] sm:$0xff]  ;;  %v1790_v34 = vld [vmem:[%s4742_s11 + $0x98] sm:$0xff] }
 0x91c   :  { %3149 = vmatpush1.bf16.msra.mxu0 %v3148_v38  ;;  %v3186_v38 = vpack.c.bf16 %v1695_v37, %v1693_v36  ;;  %v1791_v36 = vld [vmem:[%s4742_s11 + $0xa0] sm:$0xff]  ;;  %v1792_v37 = vld [vmem:[%s4742_s11 + $0xa8] sm:$0xff] }
 0x91d   :  { %3151 = vmatprep.subr.bf16.mxu0 %v3150_v39  ;;  %v1692_v39 = vld [vmem:[%s4741_s10 + $0x1c0] sm:$0xff] }
 0x91e   :  { %v3188_v42 = vpack.c.bf16 %v1694_v40, %v1692_v39  ;;  %v1793_v39 = vld [vmem:[%s4742_s11 + $0xb0] sm:$0xff]  ;;  %v1794_v40 = vld [vmem:[%s4742_s11 + $0xb8] sm:$0xff] }
 0x91f   :  { %v3228_v41 = vpack.c.bf16 %v1794_v40, %v1793_v39  ;;  %v3400_v39 = vmov 5  }
 0x920   :  { %3153 = vmatpush1.bf16.msra.mxu0 %v3152_v44  ;;  %v1696_v44 = vld [vmem:[%s4741_s10 + $0x1e0] sm:$0xff] }
 0x921   :  { %3155 = vmatprep.subr.bf16.mxu0 %v3154_v45  ;;  %v1698_v45 = vld [vmem:[%s4741_s10 + $0x1f0] sm:$0xff] }
 0x922   :  { %v3192_v48 = vpack.c.bf16 %v1698_v45, %v1696_v44 }
 0x924   :  { %3157 = vmatpush1.bf16.msra.mxu0 %v3156_v52 }
 0x925   :  { %3159 = vmatprep.subr.bf16.mxu0 %v3158_v53 }
 0x928   :  { %3161 = vmatpush1.bf16.msra.mxu0 %v3160_v13  ;;  %v1772_v13 = vld [vmem:[%s4742_s11 + $0x8] sm:$0xff] }
 0x929   :  { %3163 = vmatprep.subr.bf16.mxu0 %v3162_v57  ;;  %v1773_v57 = vld [vmem:[%s4742_s11 + $0x10] sm:$0xff] }
 0x92c   :  { %3165 = vmatpush1.bf16.msra.mxu0 %v3164_v3  ;;  %v3195_v3 = vpack.c.bf16 %v1772_v13, %v1771_v61  ;;  %v1870_v61 = vld [vmem:[%s4743_s12 + $0x10] sm:$0xff]  ;;  %v1871_v13 = vld [vmem:[%s4743_s12 + $0x18] sm:$0xff] }
 0x92d   :  { %3167 = vmatprep.subr.bf16.mxu0 %v3166_v49  ;;  %v1774_v49 = vld [vmem:[%s4742_s11 + $0x18] sm:$0xff] }
 0x92e   :  { %3196 = vmatpush1.bf16.msra.mxu1 %v3195_v3  ;;  %v3198_v8 = vpack.c.bf16 %v1774_v49, %v1773_v57  ;;  %v3234_v57 = vpack.c.bf16 %v1871_v13, %v1870_v61  ;;  %v1874_v3 = vld [vmem:[%s4743_s12 + $0x30] sm:$0xff]  ;;  %v1875_v49 = vld [vmem:[%s4743_s12 + $0x38] sm:$0xff] }
 0x92f   :  { %3197 = vmatprep.subr.bf16.mxu1 %v3398_v0 }
 0x930   :  { %3169 = vmatpush1.bf16.msra.mxu0 %v3168_v15  ;;  %v1776_v15 = vld [vmem:[%s4742_s11 + $0x28] sm:$0xff] }
 0x931   :  { %3171 = vmatprep.subr.bf16.mxu0 %v3170_v16  ;;  %v3201_v16 = vpack.c.bf16 %v1776_v15, %v1775_v14  ;;  %v1878_v15 = vld [vmem:[%s4743_s12 + $0x50] sm:$0xff] }
 0x932   :  { %3199 = vmatpush1.bf16.msra.mxu1 %v3198_v8  ;;  %v1877_v8 = vld [vmem:[%s4743_s12 + $0x48] sm:$0xff] }
 0x933   :  { %3200 = vmatprep.subr.bf16.mxu1 %v3398_v0 }
 0x934   :  { %3173 = vmatpush1.bf16.msra.mxu0 %v3172_v55  ;;  %v1780_v55 = vld [vmem:[%s4742_s11 + $0x48] sm:$0xff] }
 0x935   :  { %3175 = vmatprep.subr.bf16.mxu0 %v3174_v21  ;;  %v3207_v21 = vpack.c.bf16 %v1780_v55, %v1779_v20  ;;  %v1882_v55 = vld [vmem:[%s4743_s12 + $0x70] sm:$0xff] }
 0x936   :  { %3202 = vmatpush1.bf16.msra.mxu1 %v3201_v16  ;;  %v1879_v16 = vld [vmem:[%s4743_s12 + $0x58] sm:$0xff] }
 0x937   :  { %3203 = vmatprep.subr.bf16.mxu1 %v3398_v0  ;;  %v3246_v17 = vpack.c.bf16 %v1879_v16, %v1878_v15 }
 0x938   :  { %3177 = vmatpush1.bf16.msra.mxu0 %v3176_v27  ;;  %v1784_v27 = vld [vmem:[%s4742_s11 + $0x68] sm:$0xff] }
 0x939   :  { %3179 = vmatprep.subr.bf16.mxu0 %v3178_v28  ;;  %v3213_v28 = vpack.c.bf16 %v1784_v27, %v1783_v26  ;;  %v1886_v27 = vld [vmem:[%s4743_s12 + $0x90] sm:$0xff] }
 0x93a   :  { %3205 = vmatpush1.bf16.msra.mxu1 %v3204_v19  ;;  %v1881_v19 = vld [vmem:[%s4743_s12 + $0x68] sm:$0xff] }
 0x93b   :  { %3206 = vmatprep.subr.bf16.mxu1 %v3398_v0  ;;  %v3249_v20 = vpack.c.bf16 %v1881_v19, %v1880_v18 }
 0x93c   :  { %3181 = vmatpush1.bf16.msra.mxu0 %v3180_v56  ;;  %v3216_v56 = vpack.c.bf16 %v1786_v30, %v1785_v29  ;;  %v1888_v30 = vld [vmem:[%s4743_s12 + $0xa0] sm:$0xff] }
 0x93d   :  { %3183 = vmatprep.subr.bf16.mxu0 %v3182_v47  ;;  %v3219_v47 = vpack.c.bf16 %v1788_v32, %v1787_v31  ;;  %v1890_v32 = vld [vmem:[%s4743_s12 + $0xb0] sm:$0xff] }
 0x93e   :  { %3208 = vmatpush1.bf16.msra.mxu1 %v3207_v21  ;;  %v1883_v21 = vld [vmem:[%s4743_s12 + $0x78] sm:$0xff] }
 0x93f   :  { %3209 = vmatprep.subr.bf16.mxu1 %v3398_v0  ;;  %v3252_v22 = vpack.c.bf16 %v1883_v21, %v1882_v55 }
 0x940   :  { %3185 = vmatpush1.bf16.msra.mxu0 %v3184_v35  ;;  %v3222_v35 = vpack.c.bf16 %v1790_v34, %v1789_v33 }
 0x941   :  { %3187 = vmatprep.subr.bf16.mxu0 %v3186_v38  ;;  %v3225_v38 = vpack.c.bf16 %v1792_v37, %v1791_v36 }
 0x942   :  { %3211 = vmatpush1.bf16.msra.mxu1 %v3210_v24  ;;  %v1885_v24 = vld [vmem:[%s4743_s12 + $0x88] sm:$0xff] }
 0x943   :  { %3212 = vmatprep.subr.bf16.mxu1 %v3398_v0  ;;  %v3255_v26 = vpack.c.bf16 %v1885_v24, %v1884_v23 }
 0x944   :  { %3189 = vmatpush1.bf16.msra.mxu0 %v3188_v42  ;;  %v2670_v42 = vld [vmem:[%s4740_s9 + $0x2] ss:$0 sm:$0xff] }
 0x945   :  { %3191 = vmatprep.subr.bf16.mxu0 %v3190_v46 }
 0x946   :  { %3214 = vmatpush1.bf16.msra.mxu1 %v3213_v28  ;;  %v1887_v28 = vld [vmem:[%s4743_s12 + $0x98] sm:$0xff] }
 0x947   :  { %3215 = vmatprep.subr.bf16.mxu1 %v3398_v0  ;;  %v3258_v29 = vpack.c.bf16 %v1887_v28, %v1886_v27 }
 0x948   :  { %3193 = vmatpush1.bf16.msra.mxu0 %v3192_v48 }
 0x949   :  { %2896 = vmatprep.subr.mxu0 %v3390_v7 }
 0x94a   :  { %3217 = vmatpush1.bf16.msra.mxu1 %v3216_v56  ;;  %v1889_v56 = vld [vmem:[%s4743_s12 + $0xa8] sm:$0xff] }
 0x94b   :  { %3218 = vmatprep.subr.bf16.mxu1 %v3398_v0  ;;  %v3261_v31 = vpack.c.bf16 %v1889_v56, %v1888_v30 }
 0x94e   :  { %3220 = vmatpush1.bf16.msra.mxu1 %v3219_v47  ;;  %v1891_v47 = vld [vmem:[%s4743_s12 + $0xb8] sm:$0xff] }
 0x94f   :  { %3221 = vmatprep.subr.bf16.mxu1 %v3398_v0  ;;  %v3264_v33 = vpack.c.bf16 %v1891_v47, %v1890_v32 }
 0x952   :  { %3223 = vmatpush1.bf16.msra.mxu1 %v3222_v35 }
 0x953   :  { %3224 = vmatprep.subr.bf16.mxu1 %v3398_v0 }
 0x956   :  { %3226 = vmatpush1.bf16.msra.mxu1 %v3225_v38  ;;  %v3399_v38 = vmov 4  }
 0x957   :  { %3227 = vmatprep.subr.bf16.mxu1 %v3398_v0 }
 0x95a   :  { %3229 = vmatpush1.bf16.msra.mxu1 %v3228_v41 }
 0x95b   :  { %3230 = vmatprep.subr.bf16.mxu1 %v3398_v0 }
 0x9a5   :  { %v1407_v51 = vpop.f32.mrb[12].mxu1 }
 0x9a6   :  { %v1408_v52 = vadd.f32 %v2668_v50, %v1407_v51  ;;  %v2885_v53 = vpop.f32.mrb[13].mxu1 }
 0x9a7   :  { %v1869_v53 = vld [vmem:[%s4743_s12 + $0x8] sm:$0xff] }
 0x9a8   :  { %1412 = vrot.lane.b32.xlu0 %v1408_v52, %s3396_s17  ;;  %v1298_v60 = vpop.f32.mrb[8].mxu0  ;;  %v1868_v52 = vld [vmem:[%s4743_s12] sm:$0xff] }
 0x9a9   :  { %v1299_v62 = vadd.f32 %v2666_v54, %v1298_v60  ;;  %v1625_v2 = vpop.f32.mrb[14].mxu1  ;;  %v2880_v63 = vpop.f32.mrb[9].mxu0 }
 0x9aa   :  { %v1626_v4 = vadd.f32 %v2672_v59, %v1625_v2  ;;  %v2895_v6 = vpop.f32.mrb[15].mxu1  ;;  %v3231_v59 = vpack.c.bf16 %v1869_v53, %v1868_v52  ;;  %v1873_v2 = vld [vmem:[%s4743_s12 + $0x28] sm:$0xff] }
 0x9ab   :  { %1302 = vst.msk [vmem:[#allocation3] sm:$0xff] %vm490_vm9, %v1299_v62  ;;  %v1872_v62 = vld [vmem:[%s4743_s12 + $0x20] sm:$0xff] }
 0x9ac   :  { %1630 = vrot.lane.b32.xlu1 %v1626_v4, %s3396_s17  ;;  %v3237_v63 = vpack.c.bf16 %v1873_v2, %v1872_v62  ;;  %v3240_v4 = vpack.c.bf16 %v1875_v49, %v1874_v3  ;;  %v1876_v6 = vld [vmem:[%s4743_s12 + $0x40] sm:$0xff] }
 0x9ad   :  { %v3243_v14 = vpack.c.bf16 %v1877_v8, %v1876_v6 }
 0x9de   :  { %v1516_v43 = vpop.f32.mrb[10].mxu0 }
 0x9df   :  { %v1517_v44 = vadd.f32 %v2670_v42, %v1516_v43  ;;  %v2890_v45 = vpop.f32.mrb[11].mxu0  ;;  %v2430_v43 = vsub.s32 4, %v3736_v5 }
 0x9e1   :  { %1520 = vst.msk [vmem:[#allocation3 + $0x8] sm:$0xff] %vm490_vm9, %v1517_v44 }
 0xa1a   :  { %v1413_v46 = vpop.permute.xlu0 %1412 }
 0xa1b   :  { %1415 = vst.msk [vmem:[#allocation3] sm:$0xff] %vm604_vm10, %v1413_v46 }
 0xa1e   :  { %v1631_v48 = vpop.permute.xlu1 %1630 }
 0xa1f   :  { %1633 = vst.msk [vmem:[#allocation3 + $0x8] sm:$0xff] %vm604_vm10, %v1631_v48 }
 0xa22   :  { %v1634_v51 = vld [vmem:[#allocation3] sm:$0xff] }
 0xa26   :  { %v1635_v50 = vld [vmem:[#allocation3 + $0x8] sm:$0xff] }
 0xa27   :  { %1764 = vmatprep.mubr.f32.mxu0 %v1635_v50 }
 0xa28   :  { %1765 = vmatmul.mubr.f32.vlgmr.msra.gmra.mrb[12].mxu0 %v1634_v51 }
 0xa29   :  { %2898 = vmatprep.mubr.msk.f32.mxu0 %vm3397_vm8, %v3390_v7 }
 0xafb   :  { %v4557_v54 = vpop.f32.mrb[12].mxu0 }
 0xafc   :  { %v4559_v60 = vpop.f32.mrb[13].mxu0  ;;  %2897 = vmatpush3.msra.mxu0 %v4557_v54 }
 0xafd   :  { %2674 = vmatprep.mubr.msk.f32.mxu1 %vm490_vm9, %v4559_v60  ;;  %2901 = vmatprep.subr.mxu0 %v3390_v7 }
 0xafe   :  { %1863 = vmatmul.mubr.f32.vlgmr.msra.gmra.mrb[16].mxu1 %v4557_v54 }
 0xaff   :  { %3232 = vmatpush1.bf16.msra.mxu1 %v3231_v59  ;;  %2675 = vmatprep.mubr.msk.f32.mxu1 %vm490_vm9, %v4559_v60 }
 0xb00   :  { %3233 = vmatprep.subr.bf16.mxu1 %v3398_v0 }
 0xb03   :  { %3235 = vmatpush1.bf16.msra.mxu1 %v3234_v57 }
 0xb04   :  { %3236 = vmatprep.subr.bf16.mxu1 %v3398_v0 }
 0xb07   :  { %3238 = vmatpush1.bf16.msra.mxu1 %v3237_v63 }
 0xb08   :  { %3239 = vmatprep.subr.bf16.mxu1 %v3398_v0 }
 0xb0b   :  { %3241 = vmatpush1.bf16.msra.mxu1 %v3240_v4 }
 0xb0c   :  { %3242 = vmatprep.subr.bf16.mxu1 %v3398_v0 }
 0xb0f   :  { %3244 = vmatpush1.bf16.msra.mxu1 %v3243_v14 }
 0xb10   :  { %3245 = vmatprep.subr.bf16.mxu1 %v3398_v0 }
 0xb13   :  { %3247 = vmatpush1.bf16.msra.mxu1 %v3246_v17 }
 0xb14   :  { %3248 = vmatprep.subr.bf16.mxu1 %v3398_v0 }
 0xb17   :  { %3250 = vmatpush1.bf16.msra.mxu1 %v3249_v20 }
 0xb18   :  { %3251 = vmatprep.subr.bf16.mxu1 %v3398_v0 }
 0xb1b   :  { %3253 = vmatpush1.bf16.msra.mxu1 %v3252_v22 }
 0xb1c   :  { %3254 = vmatprep.subr.bf16.mxu1 %v3398_v0 }
 0xb1f   :  { %3256 = vmatpush1.bf16.msra.mxu1 %v3255_v26 }
 0xb20   :  { %3257 = vmatprep.subr.bf16.mxu1 %v3398_v0 }
 0xb23   :  { %3259 = vmatpush1.bf16.msra.mxu1 %v3258_v29 }
 0xb24   :  { %3260 = vmatprep.subr.bf16.mxu1 %v3398_v0 }
 0xb27   :  { %3262 = vmatpush1.bf16.msra.mxu1 %v3261_v31 }
 0xb28   :  { %3263 = vmatprep.subr.bf16.mxu1 %v3398_v0 }
 0xb2b   :  { %3265 = vmatpush1.bf16.msra.mxu1 %v3264_v33 }
 0xb2e   :  { %1957 = vmatmul.mubr.f32.vlgmr.msra.gmra.mrb[18].mxu1 %v4557_v54 }
 0xbd1   :  { %v1864_v34 = vpop.f32.mrb[16].mxu1 }
 0xbd2   :  { %v1866_v35 = vpop.f32.mrb[17].mxu1 }
 0xc01   :  { %v1958_v36 = vpop.f32.mrb[18].mxu1 }
 0xc02   :  { %2317 = vperm.xlu0 %3306, %v1958_v36   ;;  %1996 = vperm.xlu1 %3303, %v1958_v36   ;;  %v1960_v37 = vpop.f32.mrb[19].mxu1 }
 0xc06   :  { %3307 = vset.pattern.permute.xlu0 %v3399_v38  ;;  %3304 = vset.pattern.permute.xlu1 %v3392_v58 }
 0xc07   :  { %2425 = vperm.xlu0 %3307, %v1958_v36   ;;  %2100 = vperm.xlu1 %3304, %v1958_v36  }
 0xc0b   :  { %3308 = vset.pattern.permute.xlu0 %v3400_v39  ;;  %3305 = vset.pattern.permute.xlu1 %v3393_v1  ;;  %v2535_v1 = vsub.s32 5, %v3736_v5 }
 0xc0c   :  { %2530 = vperm.xlu0 %3308, %v1958_v36   ;;  %2209 = vperm.xlu1 %3305, %v1958_v36  }
 0xc35   :  { %1962 = vxpose.xlu1.b32.start.end [1/1] (short) (narrow) %v1864_v34, 8 }
 0xc81   :  { %v1997_v0 = vpop.permute.xlu1 %1996  ;;  %v2318_v42 = vpop.permute.xlu0 %2317 }
 0xc86   :  { %v2101_v40 = vpop.permute.xlu1 %2100  ;;  %v2426_v61 = vpop.permute.xlu0 %2425 }
 0xc8b   :  { %v2210_v41 = vpop.permute.xlu1 %2209  ;;  %v2531_v49 = vpop.permute.xlu0 %2530 }
 0xcb5   :  { %v1978_v44 = vpop.trf.xlu1 }
 0xcb6   :  { %v2106_v45 = vrot.slane %v1978_v44, %v3742_v10  ;;  %v2002_v58 = vrot.slane %v1978_v44, %v3739_v9  ;;  %v2215_v46 = vrot.slane %v1978_v44, %v3745_v11  ;;  %v2323_v48 = vrot.slane %v1978_v44, %v3748_v12 }
 0xcb7   :  { %v2431_v50 = vrot.slane %v1978_v44, %v2430_v43  ;;  %v2536_v62 = vrot.slane %v1978_v44, %v2535_v1 }
 0xcb8   :  { %v2107_v51 = vadd.f32 %v2106_v45, %v2101_v40  ;;  %v2003_v52 = vadd.f32 %v2002_v58, %v1997_v0  ;;  %v2216_v53 = vadd.f32 %v2215_v46, %v2210_v41  ;;  %v2324_v59 = vadd.f32 %v2323_v48, %v2318_v42  ;;  %v3365_v42 = vld [vmem:[%s4732_s1] sm:$0xff]  ;;  %s3401_s1 = smov 32  }
 0xcb9   :  { %v2432_v63 = vadd.f32 %v2431_v50, %v2426_v61  ;;  %v2537_v16 = vadd.f32 %v2536_v62, %v2531_v49 }
 0xcba   :  { %vm2108_vm15 = vcmp.ge.f32.partialorder %v2107_v51, 0.0  ;;  %v2109_v13 = vmul.f32 0.2, %v2107_v51  ;;  %vm2004_vm0 = vcmp.ge.f32.partialorder %v2003_v52, 0.0  ;;  %v2005_v57 = vmul.f32 0.2, %v2003_v52 }
 0xcbb   :  { %vm2217_vm1 = vcmp.ge.f32.partialorder %v2216_v53, 0.0  ;;  %v2218_v10 = vmul.f32 0.2, %v2216_v53  ;;  %v2326_v11 = vmul.f32 0.2, %v2324_v59  ;;  %vm2325_vm2 = vcmp.ge.f32.partialorder %v2324_v59, 0.0 }
 0xcbc   :  { %v2110_v9 = vsel %vm2108_vm15, %v2107_v51, %v2109_v13  ;;  %v2006_v2 = vsel %vm2004_vm0, %v2003_v52, %v2005_v57  ;;  %v2434_v15 = vmul.f32 0.2, %v2432_v63  ;;  %vm2433_vm3 = vcmp.ge.f32.partialorder %v2432_v63, 0.0 }
 0xcbd   :  { %v2111_v12 = vadd.f32 %v2110_v9, %v3760_v25  ;;  %v2007_v5 = vadd.f32 %v2006_v2, %v3760_v25  ;;  %v2219_v3 = vsel %vm2217_vm1, %v2216_v53, %v2218_v10  ;;  %v2327_v14 = vsel %vm2325_vm2, %v2324_v59, %v2326_v11 }
 0xcbe   :  { %v2220_v8 = vadd.f32 %v2219_v3, %v3760_v25  ;;  %v2328_v18 = vadd.f32 %v2327_v14, %v3760_v25  ;;  %v2435_v19 = vsel %vm2433_vm3, %v2432_v63, %v2434_v15  ;;  %v2539_v20 = vmul.f32 0.2, %v2537_v16 }
 0xcbf   :  { %v2112_v4 = vsel %vm398_vm6, %v2111_v12, -inf  ;;  %v2008_v6 = vsel %vm398_vm6, %v2007_v5, -inf  ;;  %vm2538_vm4 = vcmp.ge.f32.partialorder %v2537_v16, 0.0  ;;  %v2436_v21 = vadd.f32 %v2435_v19, %v3760_v25 }
 0xcc0   :  { %2113 = vmax.xlane.f32.xlu1 %v2112_v4  ;;  %2009 = vmax.xlane.f32.xlu0 %v2008_v6  ;;  %v2221_v17 = vsel %vm398_vm6, %v2220_v8, -inf  ;;  %v2329_v55 = vsel %vm398_vm6, %v2328_v18, -inf  ;;  %v2540_v22 = vsel %vm2538_vm4, %v2537_v16, %v2539_v20 }
 0xcc1   :  { %v2437_v23 = vsel %vm398_vm6, %v2436_v21, -inf  ;;  %v2541_v24 = vadd.f32 %v2540_v22, %v3760_v25 }
 0xcc3   :  { %v2542_v26 = vsel %vm398_vm6, %v2541_v24, -inf }
 0xcc4   :  { %2222 = vmax.xlane.f32.xlu0 %v2221_v17 }
 0xcc8   :  { %2330 = vmax.xlane.f32.xlu0 %v2329_v55 }
 0xccc   :  { %2438 = vmax.xlane.f32.xlu0 %v2437_v23 }
 0xcd0   :  { %2543 = vmax.xlane.f32.xlu0 %v2542_v26 }
 0xcd1   :  { %2239 = vrot.lane.b32.xlu1 %v4557_v54, %s3396_s17 }
 0xd4d   :  { %v2114_v27 = vpop.xlane.xlu1 %2113  ;;  %v2010_v28 = vpop.xlane.xlu0 %2009 }
 0xd4e   :  { %v2115_v29 = vsub.f32 %v2111_v12, %v2114_v27  ;;  %v2011_v30 = vsub.f32 %v2007_v5, %v2010_v28 }
 0xd50   :  { %v2116_v56 = vmul.f32 1.442695, %v2115_v29  ;;  %v2012_v31 = vmul.f32 1.442695, %v2011_v30  ;;  %v2678_v30 = vld [vmem:[%s4744_s13 + $0x1] ss:$0 sm:$0xff] }
 0xd51   :  { %v2223_v32 = vpop.xlane.xlu0 %2222  ;;  %v2240_v6 = vpop.permute.xlu1 %2239 }
 0xd52   :  { %3341 = vpow2.f32 %v2116_v56  ;;  %v2224_v47 = vsub.f32 %v2220_v8, %v2223_v32 }
 0xd53   :  { %3343 = vpow2.f32 %v2012_v31  ;;  %v2680_v31 = vld [vmem:[%s4744_s13 + $0x2] ss:$0 sm:$0xff] }
 0xd54   :  { %v2225_v33 = vmul.f32 1.442695, %v2224_v47 }
 0xd55   :  { %v2331_v34 = vpop.xlane.xlu0 %2330 }
 0xd56   :  { %v2332_v25 = vsub.f32 %v2328_v18, %v2331_v34  ;;  %3345 = vpow2.f32 %v2225_v33  ;;  %v2684_v33 = vld [vmem:[%s4744_s13 + $0x4] ss:$0 sm:$0xff] }
 0xd58   :  { %v2333_v35 = vmul.f32 1.442695, %v2332_v25  ;;  %v2686_v25 = vld [vmem:[%s4744_s13 + $0x5] ss:$0 sm:$0xff] }
 0xd59   :  { %v2439_v36 = vpop.xlane.xlu0 %2438 }
 0xd5a   :  { %v2440_v37 = vsub.f32 %v2436_v21, %v2439_v36  ;;  %3347 = vpow2.f32 %v2333_v35 }
 0xd5c   :  { %v3342_v38 = vpop.eup %3341  ;;  %v2441_v39 = vmul.f32 1.442695, %v2440_v37 }
 0xd5d   :  { %v3344_v0 = vpop.eup %3343  ;;  %v2544_v40 = vpop.xlane.xlu0 %2543  ;;  %v2118_v58 = vmul.f32 %v3365_v42, %v3342_v38 }
 0xd5e   :  { %3349 = vpow2.f32 %v2441_v39  ;;  %v2545_v41 = vsub.f32 %v2541_v24, %v2544_v40  ;;  %v2014_v43 = vmul.f32 %v3365_v42, %v3344_v0 }
 0xd5f   :  { %v2119_v48 = vsel %vm398_vm6, %v2118_v58, 0.0 }
 0xd60   :  { %v2546_v44 = vmul.f32 1.442695, %v2545_v41  ;;  %v2015_v45 = vsel %vm398_vm6, %v2014_v43, 0.0  ;;  %v3346_v46 = vpop.eup %3345 }
 0xd61   :  { %2016 = vadd.xlane.f32.xlu0 %v2015_v45  ;;  %v2227_v50 = vmul.f32 %v3365_v42, %v3346_v46 }
 0xd62   :  { %3351 = vpow2.f32 %v2546_v44 }
 0xd63   :  { %v2228_v52 = vsel %vm398_vm6, %v2227_v50, 0.0 }
 0xd64   :  { %v3348_v1 = vpop.eup %3347 }
 0xd65   :  { %2120 = vadd.xlane.f32.xlu0 %v2119_v48  ;;  %v2335_v53 = vmul.f32 %v3365_v42, %v3348_v1 }
 0xd67   :  { %v2336_v57 = vsel %vm398_vm6, %v2335_v53, 0.0 }
 0xd68   :  { %v3350_v51 = vpop.eup %3349 }
 0xd69   :  { %2229 = vadd.xlane.f32.xlu0 %v2228_v52  ;;  %v2443_v59 = vmul.f32 %v3365_v42, %v3350_v51 }
 0xd6b   :  { %v2444_v61 = vsel %vm398_vm6, %v2443_v59, 0.0 }
 0xd6c   :  { %v3352_v13 = vpop.eup %3351  ;;  %2445 = vadd.xlane.f32.xlu1 %v2444_v61 }
 0xd6d   :  { %2337 = vadd.xlane.f32.xlu0 %v2336_v57  ;;  %v2548_v10 = vmul.f32 %v3365_v42, %v3352_v13 }
 0xd6f   :  { %v2549_v62 = vsel %vm398_vm6, %v2548_v10, 0.0 }
 0xd70   :  { %2550 = vadd.xlane.f32.xlu1 %v2549_v62 }
 0xd81   :  { %2347 = vrot.lane.b32.xlu1 %v4557_v54, %s3401_s1 }
 0xd83   :  { %2131 = vrot.lane.b32.xlu0 %v4557_v54, %s3402_s4 }
 0xd87   :  { %2560 = vrot.lane.b32.xlu0 %v4559_v60, %s3402_s4 }
 0xdee   :  { %v2017_v9 = vpop.xlane.xlu0 %2016 }
 0xdef   :  { %v2018_v2 = vmax.f32 %v2017_v9, 1e-20 }
 0xdf1   :  { %3353 = vrcp.f32 %v2018_v2 }
 0xdf2   :  { %v2121_v11 = vpop.xlane.xlu0 %2120 }
 0xdf3   :  { %v2122_v63 = vmax.f32 %v2121_v11, 1e-20 }
 0xdf5   :  { %3355 = vrcp.f32 %v2122_v63 }
 0xdf6   :  { %v2230_v12 = vpop.xlane.xlu0 %2229 }
 0xdf7   :  { %v2231_v49 = vmax.f32 %v2230_v12, 1e-20 }
 0xdf9   :  { %3357 = vrcp.f32 %v2231_v49  ;;  %v2446_v14 = vpop.xlane.xlu1 %2445 }
 0xdfa   :  { %v2338_v5 = vpop.xlane.xlu0 %2337  ;;  %v2447_v19 = vmax.f32 %v2446_v14, 1e-20 }
 0xdfb   :  { %v3354_v3 = vpop.eup %3353  ;;  %v2339_v15 = vmax.f32 %v2338_v5, 1e-20 }
 0xdfc   :  { %v2020_v4 = vmul.f32 %v3354_v3, %v2014_v43 }
 0xdfd   :  { %3359 = vrcp.f32 %v2339_v15  ;;  %v2551_v17 = vpop.xlane.xlu1 %2550 }
 0xdfe   :  { %2899 = vmatmul.mubr.msk.f32.vlgmr.msra.gmra.mrb[14].mxu0 %vm398_vm6, %v2020_v4  ;;  %v2132_v8 = vpop.permute.xlu0 %2131  ;;  %3361 = vrcp.f32 %v2447_v19  ;;  %v2552_v22 = vmax.f32 %v2551_v17, 1e-20 }
 0xdff   :  { %2902 = vmatpush3.msra.mxu0 %v2132_v8  ;;  %2903 = vmatprep.mubr.msk.f32.mxu0 %vm3397_vm8, %v3390_v7  ;;  %v3356_v54 = vpop.eup %3355 }
 0xe00   :  { %2906 = vmatprep.subr.mxu0 %v3390_v7  ;;  %v2124_v16 = vmul.f32 %v3356_v54, %v2118_v58  ;;  %3363 = vrcp.f32 %v2552_v22 }
 0xe01   :  { %v2348_v55 = vpop.permute.xlu1 %2347 }
 0xe02   :  { %v2561_v27 = vpop.permute.xlu0 %2560 }
 0xe03   :  { %v3358_v18 = vpop.eup %3357 }
 0xe04   :  { %v2233_v20 = vmul.f32 %v3358_v18, %v2227_v50 }
 0xe06   :  { %2904 = vmatmul.mubr.msk.f32.vlgmr.msra.gmra.mrb[14].mxu0 %vm398_vm6, %v2124_v16 }
 0xe07   :  { %2907 = vmatpush3.msra.mxu0 %v2240_v6  ;;  %2908 = vmatprep.mubr.msk.f32.mxu0 %vm3397_vm8, %v3390_v7  ;;  %v3360_v21 = vpop.eup %3359 }
 0xe08   :  { %2911 = vmatprep.subr.mxu0 %v3390_v7  ;;  %v2341_v23 = vmul.f32 %v3360_v21, %v2335_v53  ;;  %v3362_v24 = vpop.eup %3361 }
 0xe09   :  { %v2449_v26 = vmul.f32 %v3362_v24, %v2443_v59 }
 0xe0a   :  { %v3364_v28 = vpop.eup %3363 }
 0xe0b   :  { %v2554_v29 = vmul.f32 %v3364_v28, %v2548_v10 }
 0xe0e   :  { %2909 = vmatmul.mubr.msk.f32.vlgmr.msra.gmra.mrb[14].mxu0 %vm398_vm6, %v2233_v20 }
 0xe0f   :  { %2912 = vmatpush3.msra.mxu0 %v2348_v55  ;;  %2913 = vmatprep.mubr.msk.f32.mxu0 %vm3397_vm8, %v3390_v7 }
 0xe10   :  { %2916 = vmatprep.subr.mxu0 %v3390_v7 }
 0xe16   :  { %2914 = vmatmul.mubr.msk.f32.vlgmr.msra.gmra.mrb[14].mxu0 %vm398_vm6, %v2341_v23 }
 0xe17   :  { %2917 = vmatpush3.msra.mxu0 %v4559_v60  ;;  %2918 = vmatprep.mubr.msk.f32.mxu0 %vm3397_vm8, %v3390_v7  ;;  %v2676_v60 = vld [vmem:[%s4744_s13] ss:$0 sm:$0xff] }
 0xe18   :  { %2921 = vmatprep.subr.mxu0 %v3390_v7  ;;  %v3266_v56 = vadd.f32 %v2678_v30, %v2676_v60 }
 0xe1a   :  { %v3267_v32 = vadd.f32 %v3266_v56, %v2680_v31 }
 0xe1e   :  { %2919 = vmatmul.mubr.msk.f32.vlgmr.msra.gmra.mrb[14].mxu0 %vm398_vm6, %v2449_v26 }
 0xe1f   :  { %2922 = vmatpush3.msra.mxu0 %v2561_v27  ;;  %2923 = vmatprep.mubr.msk.f32.mxu0 %vm3397_vm8, %v3390_v7  ;;  %v2682_v7 = vld [vmem:[%s4744_s13 + $0x3] ss:$0 sm:$0xff] }
 0xe20   :  { %v3268_v47 = vadd.f32 %v3267_v32, %v2682_v7 }
 0xe22   :  { %v3269_v34 = vadd.f32 %v3268_v47, %v2684_v33 }
 0xe24   :  { %v3270_v35 = vadd.f32 %v3269_v34, %v2686_v25 }
 0xe26   :  { %2924 = vmatmul.mubr.msk.f32.vlgmr.msra.gmra.mrb[14].mxu0 %vm398_vm6, %v2554_v29 }
 0xef9   :  { %v2632_v36 = vpop.f32.mrb[14].mxu0 }
 0xefa   :  { %v3271_v37 = vadd.f32 %v3270_v35, %v2632_v36  ;;  %v2925_v38 = vpop.f32.mrb[15].mxu0 }
 0xefc   :  { %v2638_v39 = vmul.f32 0.16666667, %v3271_v37 }
 0xefe   :  { %2640 = vst.msk [vmem:[#allocation4] sm:$0xff] %vm2639_vm5, %v2638_v39 }
 0xeff   :  { %3377 = shalt.err (!%p3374_p4)
}
 0xf00   :  { %s3378_s13 = scalar_lea.hbm %s4745_s14, 128 }
 0xf01   :  { %p3379_p5 = scmp.ne.s32.totalorder %s4745_s14, %s3378_s13  ;;  %p3382_p6 = scmp.lt.u32.totalorder %s3378_s13, %s4745_s14 }
 0xf03   :  { %p3384_p7 = pnand %p3382_p6, %p3379_p5 }
 0xf05   :  { %3387 = shalt.err (!%p3384_p7)
}
 0xf06   :  { %2650 = dma.vmem_to_hbm [thread:$0]  %s2648_s22, 128, %s4745_s14, [#allocation5]  }
 0xf07   :  { %3388 = dma.done.wait [#allocation5], 128  }
 0xf08   :  { %3389 = vsyncadd [#allocation5], 4294967168 }
 0xf09   :  { %2654 = vsyncpa [#allocation5], 1 }

</bundles_post_ra>
